<compile_context>
chip_gen: v5e
topology: v5e:2x2
jax: 0.10.0
libtpu: 0.0.40
codegen_flags: <defaults>
</compile_context>

<pallas_src>
import functools
import math

import jax
import jax.numpy as jnp
from jax import lax
from jax.experimental import pallas as pl
from jax.experimental.pallas import tpu as pltpu

EPS_CUSTOM = 1e-6    # LayerNormalization eps (custom class in the module)
EPS_TORCH_LN = 1e-5  # nn.LayerNorm default eps (mlp_head)


# ----------------------------- in-kernel helpers -----------------------------

def _custom_layernorm(x, alpha, bias, eps=EPS_CUSTOM):
    # Matches LayerNormalization: mean over last dim, UNBIASED std (ddof=1),
    # division by (std + eps) -- NOT sqrt(var + eps).  Exact divide for parity.
    d = x.shape[-1]
    mean = jnp.mean(x, axis=-1, keepdims=True)
    var = jnp.sum((x - mean) ** 2, axis=-1, keepdims=True) * (1.0 / (d - 1))
    std = jnp.sqrt(var)
    return alpha * ((x - mean) / (std + eps)) + bias


def _torch_layernorm(x, gamma, beta, eps=EPS_TORCH_LN):
    # Matches nn.LayerNorm: biased variance, sqrt(var + eps).
    mean = jnp.mean(x, axis=-1, keepdims=True)
    var = jnp.mean((x - mean) ** 2, axis=-1, keepdims=True)
    return gamma * (x - mean) * lax.rsqrt(var + eps) + beta


# ------------------------------ fused ViT kernel ------------------------------

def vit_fused_kernel(patch_ref, pw_ref, pb_ref, cls_ref, pos_ref,
                     a1_ref, b1_ref, wqkv_ref, wo_ref, a2_ref, b2_ref,
                     w1_ref, fb1_ref, w2_ref, fb2_ref,
                     enca_ref, encb_ref, lng_ref, lnb_ref, hw_ref, hb_ref,
                     out_ref, h_ref, ctx_ref, *, num_heads):
    # Grid: (batch_tiles, layers).  h_ref: (Bt, Sp, E) f32 scratch resident
    # across the layer axis; ctx_ref: (Bt, Sp, E) bf16 per-head context slab.
    l = pl.program_id(1)
    n_layers = pl.num_programs(1)
    Bt, N, Pdim = patch_ref.shape
    _, Sp, E = h_ref.shape
    S = N + 1                              # real sequence length (cls + patches)
    dk = E // num_heads

    # ---- first layer step: patch embedding + cls token + position embedding --
    @pl.when(l == 0)
    def _():
        emb = jnp.dot(patch_ref[...].reshape(Bt * N, Pdim), pw_ref[...],
                      preferred_element_type=jnp.float32) + pb_ref[...]   # (Bt*N,E)
        emb = emb.reshape(Bt, N, E) + pos_ref[1:S, :]
        cls_row = cls_ref[...] + pos_ref[0:1, :]                          # (1,E)
        h_ref[:, 0:1, :] = jnp.broadcast_to(cls_row, (Bt, 1, E))
        h_ref[:, 1:S, :] = emb
        if Sp > S:                                  # zero the padded rows
            h_ref[:, S:Sp, :] = jnp.zeros((Bt, Sp - S, E), jnp.float32)

    x = h_ref[...]                                                        # (Bt,Sp,E) f32

    # ---- residual connection 0: pre-norm multi-head self attention ----------
    xn = _custom_layernorm(x, a1_ref[0], b1_ref[0]).astype(jnp.bfloat16)
    qkv = jnp.dot(xn.reshape(Bt * Sp, E), wqkv_ref[0],
                  preferred_element_type=jnp.float32)                     # (Bt*Sp,3E)
    qkv = qkv.reshape(Bt, Sp, 3 * E).astype(jnp.bfloat16)                 # Q pre-scaled

    if Sp > S:  # mask padded key columns (built once, reused per head)
        key_valid = lax.broadcasted_iota(jnp.int32, (1, 1, Sp), 2) < S

    for h in range(num_heads):          # small head count; ctx goes straight to scratch
        lo = h * dk
        q_h = qkv[:, :, lo:lo + dk]                                       # (Bt,Sp,dk)
        k_h = qkv[:, :, E + lo:E + lo + dk]
        v_h = qkv[:, :, 2 * E + lo:2 * E + lo + dk]
        # q @ k^T without materializing a transposed slab: contract the dk axis.
        scores = lax.dot_general(
            q_h, k_h, dimension_numbers=(((2,), (2,)), ((0,), (0,))),
            preferred_element_type=jnp.float32)                           # (Bt,Sp,Sp)
        if Sp > S:
            scores = jnp.where(key_valid, scores, -1e30)
        scores = scores - jnp.max(scores, axis=-1, keepdims=True)
        p = jnp.exp(scores)
        p = p * pl.reciprocal(jnp.sum(p, axis=-1, keepdims=True), approx=True)
        ctx_h = lax.dot_general(
            p.astype(jnp.bfloat16), v_h,
            dimension_numbers=(((2,), (1,)), ((0,), (0,))),
            preferred_element_type=jnp.float32)                           # (Bt,Sp,dk)
        ctx_ref[:, :, lo:lo + dk] = ctx_h.astype(jnp.bfloat16)

    # One full-K matmul against Wo for all heads at once.
    attn = jnp.dot(ctx_ref[...].reshape(Bt * Sp, E), wo_ref[0],
                   preferred_element_type=jnp.float32).reshape(Bt, Sp, E)
    x = x + attn

    # ---- residual connection 1: pre-norm feed forward ------------------------
    xn2 = _custom_layernorm(x, a2_ref[0], b2_ref[0]).astype(jnp.bfloat16)
    hid = jnp.dot(xn2.reshape(Bt * Sp, E), w1_ref[0],
                  preferred_element_type=jnp.float32) + fb1_ref[0]        # (Bt*Sp,F)
    hid = jnp.maximum(hid, 0.0).astype(jnp.bfloat16)
    ff = (jnp.dot(hid, w2_ref[0], preferred_element_type=jnp.float32)
          + fb2_ref[0]).reshape(Bt, Sp, E)
    x = x + ff
    h_ref[...] = x

    # ---- last layer step: Encoder.norm(cls) -> nn.LayerNorm -> Linear head ---
    @pl.when(l == n_layers - 1)
    def _():
        c = x[:, 0, :]                                                    # (Bt,E) cls
        c = _custom_layernorm(c, enca_ref[...], encb_ref[...])            # Encoder.norm
        c = _torch_layernorm(c, lng_ref[...], lnb_ref[...])               # mlp_head LN
        logits = jnp.dot(c.astype(jnp.bfloat16), hw_ref[...],
                         preferred_element_type=jnp.float32) + hb_ref[...]
        out_ref[:, 0, :] = logits


# --------------------------------- wrapper -------------------------------------

def extract_patches(x, patch_size):
    # x: (B, C, H, W) NCHW -> (B, num_patches, C*p*p); inner order (C, p, p)
    # matches a Conv2d weight reshaped (E, C*p*p) and transposed to (C*p*p, E).
    B, C, H, W = x.shape
    p = patch_size
    nh, nw = H // p, W // p
    x = x.reshape(B, C, nh, p, nw, p)
    x = x.transpose(0, 2, 4, 1, 3, 5)          # (B, nh, nw, C, p, p)
    return x.reshape(B, nh * nw, C * p * p)


def _pick_batch_tile(B):
    # Largest divisor of B that still leaves >= 2 batch grid steps (keeps both
    # v7x TensorCores fed); fall back to 1 when B < 2.
    if B <= 1:
        return 1
    for bt in range(B // 2, 0, -1):
        if B % bt == 0:
            return bt
    return 1


def _vmem_limit_bytes():
    # Generation-aware VMEM budget: ~5/8 of physical capacity, capped at 48 MiB
    # (48 MiB on v5e/v6e with 128 MiB, ~40 MiB on v7x with 64 MiB per TC).
    cap = 64 * 1024 * 1024
    try:
        cap = int(pltpu.get_tpu_info().vmem_capacity_bytes)
    except Exception:
        pass
    return int(min(48 * 1024 * 1024, cap * 5 // 8))


def vit_forward(x, params, *, patch_size, num_heads, num_classes, batch_tile=None):
    patches = extract_patches(x, patch_size).astype(jnp.bfloat16)
    B, N, Pdim = patches.shape
    Sp, E = params["pos"].shape                 # pos is pre-padded to Sp rows
    L = params["wqkv"].shape[0]
    Cpad = params["head_w"].shape[1]

    Bt = _pick_batch_tile(B) if batch_tile is None else batch_tile
    assert B % Bt == 0

    kern = functools.partial(vit_fused_kernel, num_heads=num_heads)

    def const_spec(arr):
        return pl.BlockSpec(arr.shape, lambda b, l, nd=arr.ndim: (0,) * nd)

    def layer_spec(arr):
        return pl.BlockSpec((1,) + arr.shape[1:], lambda b, l: (l, 0, 0))

    logits_padded = pl.pallas_call(
        kern,
        out_shape=jax.ShapeDtypeStruct((B, 1, Cpad), jnp.float32),
        grid=(B // Bt, L),
        in_specs=[
            pl.BlockSpec((Bt, N, Pdim), lambda b, l: (b, 0, 0)),   # patches
            const_spec(params["patch_w"]), const_spec(params["patch_b"]),
            const_spec(params["cls"]), const_spec(params["pos"]),
            layer_spec(params["a1"]), layer_spec(params["b1"]),
            layer_spec(params["wqkv"]), layer_spec(params["wo"]),
            layer_spec(params["a2"]), layer_spec(params["b2"]),
            layer_spec(params["w1"]), layer_spec(params["fb1"]),
            layer_spec(params["w2"]), layer_spec(params["fb2"]),
            const_spec(params["enc_a"]), const_spec(params["enc_b"]),
            const_spec(params["ln_g"]), const_spec(params["ln_b"]),
            const_spec(params["head_w"]), const_spec(params["head_b"]),
        ],
        out_specs=pl.BlockSpec((Bt, 1, Cpad), lambda b, l: (b, 0, 0)),
        scratch_shapes=[pltpu.VMEM((Bt, Sp, E), jnp.float32),      # residual stream
                        pltpu.VMEM((Bt, Sp, E), jnp.bfloat16)],    # per-head ctx slab
        compiler_params=pltpu.CompilerParams(
            dimension_semantics=("parallel", "arbitrary"),
            vmem_limit_bytes=_vmem_limit_bytes()),
    )(patches, params["patch_w"], params["patch_b"], params["cls"], params["pos"],
      params["a1"], params["b1"], params["wqkv"], params["wo"],
      params["a2"], params["b2"], params["w1"], params["fb1"],
      params["w2"], params["fb2"],
      params["enc_a"], params["enc_b"], params["ln_g"], params["ln_b"],
      params["head_w"], params["head_b"])
    return logits_padded[:, 0, :num_classes]


# -------------------------------- parameters -----------------------------------

def init_vit_params(key, *, input_channels, embed_dim, patch_size, num_patches,
                    num_heads, num_encoders, num_classes, hidden_dim):
    E, F, L = embed_dim, hidden_dim, num_encoders
    pdim = input_channels * patch_size * patch_size
    S = num_patches + 1
    Sp = ((S + 7) // 8) * 8                              # sublane-aligned sequence
    cpad = ((num_classes + 127) // 128) * 128            # lane-dense head output
    dk = E // num_heads
    inv_sqrt_dk = 1.0 / math.sqrt(dk)

    keys = iter(jax.random.split(key, 4 + 6 * L))

    def nrm(shape, scale=0.02):
        return scale * jax.random.normal(next(keys), shape, dtype=jnp.float32)

    params = {
        # Conv2d weight must be flattened in (C, kh, kw) order and transposed.
        "patch_w": nrm((pdim, E)).astype(jnp.bfloat16),
        "patch_b": jnp.zeros((1, E), jnp.float32),
        "cls": nrm((1, E), 1.0),
        "enc_a": jnp.ones((1, E), jnp.float32),
        "enc_b": jnp.zeros((1, E), jnp.float32),
        "ln_g": jnp.ones((1, E), jnp.float32),
        "ln_b": jnp.zeros((1, E), jnp.float32),
    }
    pos = nrm((S, E), 1.0)
    params["pos"] = jnp.pad(pos, ((0, Sp - S), (0, 0)))  # padded rows are zero
    hw = nrm((E, num_classes))
    params["head_w"] = jnp.pad(hw, ((0, 0), (0, cpad - num_classes))).astype(jnp.bfloat16)
    params["head_b"] = jnp.zeros((1, cpad), jnp.float32)

    wqkv, wo, a1, b1, a2, b2, w1, fb1, w2, fb2 = ([] for _ in range(10))
    for _ in range(L):
        wq, wk, wv = nrm((E, E)), nrm((E, E)), nrm((E, E))
        # fused QKV (E, 3E); 1/sqrt(dk) folded into the Q columns.
        wqkv.append(jnp.concatenate([wq * inv_sqrt_dk, wk, wv], axis=1)
                    .astype(jnp.bfloat16))
        wo.append(nrm((E, E)).astype(jnp.bfloat16))
        w1.append(nrm((E, F)).astype(jnp.bfloat16))
        w2.append(nrm((F, E)).astype(jnp.bfloat16))
        a1.append(jnp.ones((1, E), jnp.float32))
        b1.append(jnp.zeros((1, E), jnp.float32))
        a2.append(jnp.ones((1, E), jnp.float32))
        b2.append(jnp.zeros((1, E), jnp.float32))
        fb1.append(jnp.zeros((1, F), jnp.float32))
        fb2.append(jnp.zeros((1, E), jnp.float32))
    params.update(
        wqkv=jnp.stack(wqkv), wo=jnp.stack(wo),
        a1=jnp.stack(a1), b1=jnp.stack(b1), a2=jnp.stack(a2), b2=jnp.stack(b2),
        w1=jnp.stack(w1), fb1=jnp.stack(fb1), w2=jnp.stack(w2), fb2=jnp.stack(fb2))
    return params


# ------------------------------------ main --------------------------------------

if __name__ == "__main__":
    B, C, H, W = 4, 3, 16, 16
    patch_size = 8
    num_patches = (H // patch_size) * (W // patch_size)   # 4
    embed_dim, num_heads, num_encoders = 32, 4, 2
    hidden_dim, num_classes = 64, 10

    key = jax.random.PRNGKey(0)
    kx, kp = jax.random.split(key)
    x = jax.random.normal(kx, (B, C, H, W), dtype=jnp.float32)
    params = init_vit_params(
        kp, input_channels=C, embed_dim=embed_dim, patch_size=patch_size,
        num_patches=num_patches, num_heads=num_heads, num_encoders=num_encoders,
        num_classes=num_classes, hidden_dim=hidden_dim)

    logits = vit_forward(x, params, patch_size=patch_size,
                         num_heads=num_heads, num_classes=num_classes)
    jax.block_until_ready(logits)
    assert logits.shape == (B, num_classes), logits.shape
    assert bool(jnp.all(jnp.isfinite(logits))), "non-finite logits"
    print("KERNEL_OK")
</pallas_src>

<mosaic_0001>
module attributes {stable_mosaic.version = 11 : i64} {
  func.func @vit_fused_kernel(%arg0: i32, %arg1: i32, %arg2: memref<2x4x192xbf16, #tpu.memory_space<vmem>>, %arg3: memref<192x32xbf16, #tpu.memory_space<vmem>>, %arg4: memref<1x32xf32, #tpu.memory_space<vmem>>, %arg5: memref<1x32xf32, #tpu.memory_space<vmem>>, %arg6: memref<8x32xf32, #tpu.memory_space<vmem>>, %arg7: memref<1x1x32xf32, #tpu.memory_space<vmem>>, %arg8: memref<1x1x32xf32, #tpu.memory_space<vmem>>, %arg9: memref<1x32x96xbf16, #tpu.memory_space<vmem>>, %arg10: memref<1x32x32xbf16, #tpu.memory_space<vmem>>, %arg11: memref<1x1x32xf32, #tpu.memory_space<vmem>>, %arg12: memref<1x1x32xf32, #tpu.memory_space<vmem>>, %arg13: memref<1x32x64xbf16, #tpu.memory_space<vmem>>, %arg14: memref<1x1x64xf32, #tpu.memory_space<vmem>>, %arg15: memref<1x64x32xbf16, #tpu.memory_space<vmem>>, %arg16: memref<1x1x32xf32, #tpu.memory_space<vmem>>, %arg17: memref<1x32xf32, #tpu.memory_space<vmem>>, %arg18: memref<1x32xf32, #tpu.memory_space<vmem>>, %arg19: memref<1x32xf32, #tpu.memory_space<vmem>>, %arg20: memref<1x32xf32, #tpu.memory_space<vmem>>, %arg21: memref<32x128xbf16, #tpu.memory_space<vmem>>, %arg22: memref<1x128xf32, #tpu.memory_space<vmem>>, %arg23: memref<2x1x128xf32, #tpu.memory_space<vmem>>, %arg24: memref<2x8x32xf32, #tpu.memory_space<vmem>>, %arg25: memref<2x8x32xbf16, #tpu.memory_space<vmem>>) attributes {dimension_semantics = [#tpu.dimension_semantics<parallel>, #tpu.dimension_semantics<arbitrary>], iteration_bounds = array<i64: 2, 2>, scalar_prefetch = 0 : i64, scratch_operands = 2 : i64, tpu.core_type = #tpu.core_type<tc>, window_params = [{transform_indices = @transform_0, window_bounds = array<i64: 2, 4, 192>}, {pipeline_mode = #tpu.pipeline_mode<synchronous>, transform_indices = @transform_1, window_bounds = array<i64: 192, 32>}, {pipeline_mode = #tpu.pipeline_mode<synchronous>, transform_indices = @transform_2, window_bounds = array<i64: 1, 32>}, {pipeline_mode = #tpu.pipeline_mode<synchronous>, transform_indices = @transform_3, window_bounds = array<i64: 1, 32>}, {pipeline_mode = #tpu.pipeline_mode<synchronous>, transform_indices = @transform_4, window_bounds = array<i64: 8, 32>}, {transform_indices = @transform_5, window_bounds = array<i64: 1, 1, 32>}, {transform_indices = @transform_6, window_bounds = array<i64: 1, 1, 32>}, {transform_indices = @transform_7, window_bounds = array<i64: 1, 32, 96>}, {transform_indices = @transform_8, window_bounds = array<i64: 1, 32, 32>}, {transform_indices = @transform_9, window_bounds = array<i64: 1, 1, 32>}, {transform_indices = @transform_10, window_bounds = array<i64: 1, 1, 32>}, {transform_indices = @transform_11, window_bounds = array<i64: 1, 32, 64>}, {transform_indices = @transform_12, window_bounds = array<i64: 1, 1, 64>}, {transform_indices = @transform_13, window_bounds = array<i64: 1, 64, 32>}, {transform_indices = @transform_14, window_bounds = array<i64: 1, 1, 32>}, {pipeline_mode = #tpu.pipeline_mode<synchronous>, transform_indices = @transform_15, window_bounds = array<i64: 1, 32>}, {pipeline_mode = #tpu.pipeline_mode<synchronous>, transform_indices = @transform_16, window_bounds = array<i64: 1, 32>}, {pipeline_mode = #tpu.pipeline_mode<synchronous>, transform_indices = @transform_17, window_bounds = array<i64: 1, 32>}, {pipeline_mode = #tpu.pipeline_mode<synchronous>, transform_indices = @transform_18, window_bounds = array<i64: 1, 32>}, {pipeline_mode = #tpu.pipeline_mode<synchronous>, transform_indices = @transform_19, window_bounds = array<i64: 32, 128>}, {pipeline_mode = #tpu.pipeline_mode<synchronous>, transform_indices = @transform_20, window_bounds = array<i64: 1, 128>}, {transform_indices = @transform_21, window_bounds = array<i64: 2, 1, 128>}]} {
    %c0_i32 = arith.constant 0 : i32
    %0 = arith.cmpi eq, %arg1, %c0_i32 : i32
    %1 = arith.extui %0 : i1 to i32
    %c0_i32_0 = arith.constant 0 : i32
    %2 = arith.cmpi ne, %1, %c0_i32_0 : i32
    scf.if %2 {
      %c0_83 = arith.constant 0 : index
      %c0_84 = arith.constant 0 : index
      %c0_85 = arith.constant 0 : index
      %190 = vector.load %arg2[%c0_83, %c0_84, %c0_85] : memref<2x4x192xbf16, #tpu.memory_space<vmem>>, vector<2x4x192xbf16>
      %191 = vector.shape_cast %190 : vector<2x4x192xbf16> to vector<8x192xbf16>
      %c0_86 = arith.constant 0 : index
      %c0_87 = arith.constant 0 : index
      %192 = vector.load %arg3[%c0_86, %c0_87] : memref<192x32xbf16, #tpu.memory_space<vmem>>, vector<192x32xbf16>
      %cst_88 = arith.constant dense<0.000000e+00> : vector<8x32xf32>
      %193 = tpu.matmul %191, %192, %cst_88 {dimension_numbers = #tpu.dot_dimension_numbers<[1], [0], [0], [1], [0, 0, 1, 1], [], []>} : vector<8x192xbf16>, vector<192x32xbf16>, vector<8x32xf32> -> vector<8x32xf32>
      %c0_89 = arith.constant 0 : index
      %c0_90 = arith.constant 0 : index
      %194 = vector.load %arg4[%c0_89, %c0_90] : memref<1x32xf32, #tpu.memory_space<vmem>>, vector<1x32xf32>
      %195 = vector.broadcast %194 : vector<1x32xf32> to vector<8x32xf32>
      %196 = arith.addf %193, %195 : vector<8x32xf32>
      %197 = vector.shape_cast %196 : vector<8x32xf32> to vector<2x4x32xf32>
      %c1 = arith.constant 1 : index
      %c0_91 = arith.constant 0 : index
      %198 = vector.load %arg6[%c1, %c0_91] : memref<8x32xf32, #tpu.memory_space<vmem>>, vector<4x32xf32>
      %199 = vector.shape_cast %198 : vector<4x32xf32> to vector<1x4x32xf32>
      %200 = vector.broadcast %199 : vector<1x4x32xf32> to vector<2x4x32xf32>
      %201 = arith.addf %197, %200 : vector<2x4x32xf32>
      %c0_92 = arith.constant 0 : index
      %c0_93 = arith.constant 0 : index
      %202 = vector.load %arg5[%c0_92, %c0_93] : memref<1x32xf32, #tpu.memory_space<vmem>>, vector<1x32xf32>
      %c0_94 = arith.constant 0 : index
      %c0_95 = arith.constant 0 : index
      %203 = vector.load %arg6[%c0_94, %c0_95] : memref<8x32xf32, #tpu.memory_space<vmem>>, vector<1x32xf32>
      %204 = arith.addf %202, %203 : vector<1x32xf32>
      %205 = vector.shape_cast %204 : vector<1x32xf32> to vector<1x1x32xf32>
      %206 = vector.broadcast %205 : vector<1x1x32xf32> to vector<2x1x32xf32>
      %c0_96 = arith.constant 0 : index
      %c0_97 = arith.constant 0 : index
      %c0_98 = arith.constant 0 : index
      %207 = vector.load %arg24[%c0_96, %c0_97, %c0_98] : memref<2x8x32xf32, #tpu.memory_space<vmem>>, vector<2x1x32xf32>
      tpu.vector_store %arg24[%c0_96, %c0_97, %c0_98], %206 {strides = array<i32>} : memref<2x8x32xf32, #tpu.memory_space<vmem>>, vector<2x1x32xf32>,
      %c0_99 = arith.constant 0 : index
      %c1_100 = arith.constant 1 : index
      %c0_101 = arith.constant 0 : index
      %208 = vector.load %arg24[%c0_99, %c1_100, %c0_101] : memref<2x8x32xf32, #tpu.memory_space<vmem>>, vector<2x4x32xf32>
      tpu.vector_store %arg24[%c0_99, %c1_100, %c0_101], %201 {strides = array<i32>} : memref<2x8x32xf32, #tpu.memory_space<vmem>>, vector<2x4x32xf32>,
      %cst_102 = arith.constant 0.000000e+00 : f32
      %209 = vector.broadcast %cst_102 : f32 to vector<2x3x32xf32>
      %c0_103 = arith.constant 0 : index
      %c5 = arith.constant 5 : index
      %c0_104 = arith.constant 0 : index
      %210 = vector.load %arg24[%c0_103, %c5, %c0_104] : memref<2x8x32xf32, #tpu.memory_space<vmem>>, vector<2x3x32xf32>
      tpu.vector_store %arg24[%c0_103, %c5, %c0_104], %209 {strides = array<i32>} : memref<2x8x32xf32, #tpu.memory_space<vmem>>, vector<2x3x32xf32>,
    } else {
    }
    %c0 = arith.constant 0 : index
    %c0_1 = arith.constant 0 : index
    %c0_2 = arith.constant 0 : index
    %3 = vector.load %arg24[%c0, %c0_1, %c0_2] : memref<2x8x32xf32, #tpu.memory_space<vmem>>, vector<2x8x32xf32>
    %c0_3 = arith.constant 0 : index
    %c0_4 = arith.constant 0 : index
    %c0_5 = arith.constant 0 : index
    %4 = vector.load %arg7[%c0_3, %c0_4, %c0_5] : memref<1x1x32xf32, #tpu.memory_space<vmem>>, vector<1x1x32xf32>
    %5 = vector.shape_cast %4 : vector<1x1x32xf32> to vector<1x32xf32>
    %c0_6 = arith.constant 0 : index
    %c0_7 = arith.constant 0 : index
    %c0_8 = arith.constant 0 : index
    %6 = vector.load %arg8[%c0_6, %c0_7, %c0_8] : memref<1x1x32xf32, #tpu.memory_space<vmem>>, vector<1x1x32xf32>
    %7 = vector.shape_cast %6 : vector<1x1x32xf32> to vector<1x32xf32>
    %cst = arith.constant dense<0.000000e+00> : vector<2x8xf32>
    %8 = vector.multi_reduction <add>, %3, %cst [2] : vector<2x8x32xf32> to vector<2x8xf32>
    %9 = vector.shape_cast %8 : vector<2x8xf32> to vector<2x8x1xf32>
    %cst_9 = arith.constant 3.200000e+01 : f32
    %10 = vector.broadcast %cst_9 : f32 to vector<2x8x1xf32>
    %11 = arith.divf %9, %10 : vector<2x8x1xf32>
    %12 = vector.broadcast %11 : vector<2x8x1xf32> to vector<2x8x32xf32>
    %13 = arith.subf %3, %12 : vector<2x8x32xf32>
    %14 = arith.mulf %13, %13 : vector<2x8x32xf32>
    %cst_10 = arith.constant dense<0.000000e+00> : vector<2x8xf32>
    %15 = vector.multi_reduction <add>, %14, %cst_10 [2] : vector<2x8x32xf32> to vector<2x8xf32>
    %16 = vector.shape_cast %15 : vector<2x8xf32> to vector<2x8x1xf32>
    %cst_11 = arith.constant 0.0322580636 : f32
    %17 = vector.broadcast %cst_11 : f32 to vector<2x8x1xf32>
    %18 = arith.mulf %16, %17 : vector<2x8x1xf32>
    %19 = math.sqrt %18 : vector<2x8x1xf32>
    %20 = vector.broadcast %11 : vector<2x8x1xf32> to vector<2x8x32xf32>
    %21 = arith.subf %3, %20 : vector<2x8x32xf32>
    %cst_12 = arith.constant 9.99999997E-7 : f32
    %22 = vector.broadcast %cst_12 : f32 to vector<2x8x1xf32>
    %23 = arith.addf %19, %22 : vector<2x8x1xf32>
    %24 = vector.broadcast %23 : vector<2x8x1xf32> to vector<2x8x32xf32>
    %25 = arith.divf %21, %24 : vector<2x8x32xf32>
    %26 = vector.shape_cast %5 : vector<1x32xf32> to vector<1x1x32xf32>
    %27 = vector.broadcast %26 : vector<1x1x32xf32> to vector<2x8x32xf32>
    %28 = arith.mulf %27, %25 : vector<2x8x32xf32>
    %29 = vector.shape_cast %7 : vector<1x32xf32> to vector<1x1x32xf32>
    %30 = vector.broadcast %29 : vector<1x1x32xf32> to vector<2x8x32xf32>
    %31 = arith.addf %28, %30 : vector<2x8x32xf32>
    %32 = arith.truncf %31 : vector<2x8x32xf32> to vector<2x8x32xbf16>
    %33 = vector.shape_cast %32 : vector<2x8x32xbf16> to vector<16x32xbf16>
    %c0_13 = arith.constant 0 : index
    %c0_14 = arith.constant 0 : index
    %c0_15 = arith.constant 0 : index
    %34 = vector.load %arg9[%c0_13, %c0_14, %c0_15] : memref<1x32x96xbf16, #tpu.memory_space<vmem>>, vector<1x32x96xbf16>
    %35 = vector.shape_cast %34 : vector<1x32x96xbf16> to vector<32x96xbf16>
    %cst_16 = arith.constant dense<0.000000e+00> : vector<16x96xf32>
    %36 = tpu.matmul %33, %35, %cst_16 {dimension_numbers = #tpu.dot_dimension_numbers<[1], [0], [0], [1], [0, 0, 1, 1], [], []>} : vector<16x32xbf16>, vector<32x96xbf16>, vector<16x96xf32> -> vector<16x96xf32>
    %37 = vector.shape_cast %36 : vector<16x96xf32> to vector<2x8x96xf32>
    %38 = arith.truncf %37 : vector<2x8x96xf32> to vector<2x8x96xbf16>
    %39 = tpu.iota {dimensions = array<i32: 2>} : vector<1x1x8xi32>
    %c5_i32 = arith.constant 5 : i32
    %40 = vector.broadcast %c5_i32 : i32 to vector<1x1x8xi32>
    %41 = arith.cmpi slt, %39, %40 : vector<1x1x8xi32>
    %42 = vector.extract_strided_slice %38 {offsets = [0, 0, 0], sizes = [2, 8, 8], strides = [1, 1, 1]} : vector<2x8x96xbf16> to vector<2x8x8xbf16>
    %43 = vector.extract_strided_slice %38 {offsets = [0, 0, 32], sizes = [2, 8, 8], strides = [1, 1, 1]} : vector<2x8x96xbf16> to vector<2x8x8xbf16>
    %44 = vector.extract_strided_slice %38 {offsets = [0, 0, 64], sizes = [2, 8, 8], strides = [1, 1, 1]} : vector<2x8x96xbf16> to vector<2x8x8xbf16>
    %cst_17 = arith.constant dense<0.000000e+00> : vector<2x8x8xf32>
    %45 = tpu.matmul %42, %43, %cst_17 {dimension_numbers = #tpu.dot_dimension_numbers<[2], [2], [1], [1], [0, 0, 0, 1, 1, 1], [0], [0]>} : vector<2x8x8xbf16>, vector<2x8x8xbf16>, vector<2x8x8xf32> -> vector<2x8x8xf32>
    %cst_18 = arith.constant -1.000000e+30 : f32
    %46 = vector.shape_cast %41 : vector<1x1x8xi1> to vector<1x1x8xi1>
    %47 = vector.broadcast %46 : vector<1x1x8xi1> to vector<2x8x8xi1>
    %48 = vector.broadcast %cst_18 : f32 to vector<2x8x8xf32>
    %49 = arith.select %47, %45, %48 : vector<2x8x8xi1>, vector<2x8x8xf32>
    %cst_19 = arith.constant dense<0xFF800000> : vector<2x8xf32>
    %50 = vector.multi_reduction <maximumf>, %49, %cst_19 [2] : vector<2x8x8xf32> to vector<2x8xf32>
    %51 = vector.shape_cast %50 : vector<2x8xf32> to vector<2x8x1xf32>
    %52 = vector.broadcast %51 : vector<2x8x1xf32> to vector<2x8x8xf32>
    %53 = arith.subf %49, %52 : vector<2x8x8xf32>
    %54 = math.exp %53 : vector<2x8x8xf32>
    %cst_20 = arith.constant dense<0.000000e+00> : vector<2x8xf32>
    %55 = vector.multi_reduction <add>, %54, %cst_20 [2] : vector<2x8x8xf32> to vector<2x8xf32>
    %56 = vector.shape_cast %55 : vector<2x8xf32> to vector<2x8x1xf32>
    %57 = tpu.reciprocal %56 {approx = true} : vector<2x8x1xf32> -> vector<2x8x1xf32>
    %58 = vector.broadcast %57 : vector<2x8x1xf32> to vector<2x8x8xf32>
    %59 = arith.mulf %54, %58 : vector<2x8x8xf32>
    %60 = arith.truncf %59 : vector<2x8x8xf32> to vector<2x8x8xbf16>
    %cst_21 = arith.constant dense<0.000000e+00> : vector<2x8x8xf32>
    %61 = tpu.matmul %60, %44, %cst_21 {dimension_numbers = #tpu.dot_dimension_numbers<[2], [1], [1], [2], [0, 0, 0, 1, 1, 2], [0], [0]>} : vector<2x8x8xbf16>, vector<2x8x8xbf16>, vector<2x8x8xf32> -> vector<2x8x8xf32>
    %62 = arith.truncf %61 : vector<2x8x8xf32> to vector<2x8x8xbf16>
    %c0_22 = arith.constant 0 : index
    %c0_23 = arith.constant 0 : index
    %c0_24 = arith.constant 0 : index
    %63 = vector.load %arg25[%c0_22, %c0_23, %c0_24] : memref<2x8x32xbf16, #tpu.memory_space<vmem>>, vector<2x8x8xbf16>
    tpu.vector_store %arg25[%c0_22, %c0_23, %c0_24], %62 {strides = array<i32>} : memref<2x8x32xbf16, #tpu.memory_space<vmem>>, vector<2x8x8xbf16>,
    %64 = vector.extract_strided_slice %38 {offsets = [0, 0, 8], sizes = [2, 8, 8], strides = [1, 1, 1]} : vector<2x8x96xbf16> to vector<2x8x8xbf16>
    %65 = vector.extract_strided_slice %38 {offsets = [0, 0, 40], sizes = [2, 8, 8], strides = [1, 1, 1]} : vector<2x8x96xbf16> to vector<2x8x8xbf16>
    %66 = vector.extract_strided_slice %38 {offsets = [0, 0, 72], sizes = [2, 8, 8], strides = [1, 1, 1]} : vector<2x8x96xbf16> to vector<2x8x8xbf16>
    %cst_25 = arith.constant dense<0.000000e+00> : vector<2x8x8xf32>
    %67 = tpu.matmul %64, %65, %cst_25 {dimension_numbers = #tpu.dot_dimension_numbers<[2], [2], [1], [1], [0, 0, 0, 1, 1, 1], [0], [0]>} : vector<2x8x8xbf16>, vector<2x8x8xbf16>, vector<2x8x8xf32> -> vector<2x8x8xf32>
    %cst_26 = arith.constant -1.000000e+30 : f32
    %68 = vector.shape_cast %41 : vector<1x1x8xi1> to vector<1x1x8xi1>
    %69 = vector.broadcast %68 : vector<1x1x8xi1> to vector<2x8x8xi1>
    %70 = vector.broadcast %cst_26 : f32 to vector<2x8x8xf32>
    %71 = arith.select %69, %67, %70 : vector<2x8x8xi1>, vector<2x8x8xf32>
    %cst_27 = arith.constant dense<0xFF800000> : vector<2x8xf32>
    %72 = vector.multi_reduction <maximumf>, %71, %cst_27 [2] : vector<2x8x8xf32> to vector<2x8xf32>
    %73 = vector.shape_cast %72 : vector<2x8xf32> to vector<2x8x1xf32>
    %74 = vector.broadcast %73 : vector<2x8x1xf32> to vector<2x8x8xf32>
    %75 = arith.subf %71, %74 : vector<2x8x8xf32>
    %76 = math.exp %75 : vector<2x8x8xf32>
    %cst_28 = arith.constant dense<0.000000e+00> : vector<2x8xf32>
    %77 = vector.multi_reduction <add>, %76, %cst_28 [2] : vector<2x8x8xf32> to vector<2x8xf32>
    %78 = vector.shape_cast %77 : vector<2x8xf32> to vector<2x8x1xf32>
    %79 = tpu.reciprocal %78 {approx = true} : vector<2x8x1xf32> -> vector<2x8x1xf32>
    %80 = vector.broadcast %79 : vector<2x8x1xf32> to vector<2x8x8xf32>
    %81 = arith.mulf %76, %80 : vector<2x8x8xf32>
    %82 = arith.truncf %81 : vector<2x8x8xf32> to vector<2x8x8xbf16>
    %cst_29 = arith.constant dense<0.000000e+00> : vector<2x8x8xf32>
    %83 = tpu.matmul %82, %66, %cst_29 {dimension_numbers = #tpu.dot_dimension_numbers<[2], [1], [1], [2], [0, 0, 0, 1, 1, 2], [0], [0]>} : vector<2x8x8xbf16>, vector<2x8x8xbf16>, vector<2x8x8xf32> -> vector<2x8x8xf32>
    %84 = arith.truncf %83 : vector<2x8x8xf32> to vector<2x8x8xbf16>
    %c0_30 = arith.constant 0 : index
    %c0_31 = arith.constant 0 : index
    %c8 = arith.constant 8 : index
    %85 = vector.load %arg25[%c0_30, %c0_31, %c8] : memref<2x8x32xbf16, #tpu.memory_space<vmem>>, vector<2x8x8xbf16>
    tpu.vector_store %arg25[%c0_30, %c0_31, %c8], %84 {strides = array<i32>} : memref<2x8x32xbf16, #tpu.memory_space<vmem>>, vector<2x8x8xbf16>,
    %86 = vector.extract_strided_slice %38 {offsets = [0, 0, 16], sizes = [2, 8, 8], strides = [1, 1, 1]} : vector<2x8x96xbf16> to vector<2x8x8xbf16>
    %87 = vector.extract_strided_slice %38 {offsets = [0, 0, 48], sizes = [2, 8, 8], strides = [1, 1, 1]} : vector<2x8x96xbf16> to vector<2x8x8xbf16>
    %88 = vector.extract_strided_slice %38 {offsets = [0, 0, 80], sizes = [2, 8, 8], strides = [1, 1, 1]} : vector<2x8x96xbf16> to vector<2x8x8xbf16>
    %cst_32 = arith.constant dense<0.000000e+00> : vector<2x8x8xf32>
    %89 = tpu.matmul %86, %87, %cst_32 {dimension_numbers = #tpu.dot_dimension_numbers<[2], [2], [1], [1], [0, 0, 0, 1, 1, 1], [0], [0]>} : vector<2x8x8xbf16>, vector<2x8x8xbf16>, vector<2x8x8xf32> -> vector<2x8x8xf32>
    %cst_33 = arith.constant -1.000000e+30 : f32
    %90 = vector.shape_cast %41 : vector<1x1x8xi1> to vector<1x1x8xi1>
    %91 = vector.broadcast %90 : vector<1x1x8xi1> to vector<2x8x8xi1>
    %92 = vector.broadcast %cst_33 : f32 to vector<2x8x8xf32>
    %93 = arith.select %91, %89, %92 : vector<2x8x8xi1>, vector<2x8x8xf32>
    %cst_34 = arith.constant dense<0xFF800000> : vector<2x8xf32>
    %94 = vector.multi_reduction <maximumf>, %93, %cst_34 [2] : vector<2x8x8xf32> to vector<2x8xf32>
    %95 = vector.shape_cast %94 : vector<2x8xf32> to vector<2x8x1xf32>
    %96 = vector.broadcast %95 : vector<2x8x1xf32> to vector<2x8x8xf32>
    %97 = arith.subf %93, %96 : vector<2x8x8xf32>
    %98 = math.exp %97 : vector<2x8x8xf32>
    %cst_35 = arith.constant dense<0.000000e+00> : vector<2x8xf32>
    %99 = vector.multi_reduction <add>, %98, %cst_35 [2] : vector<2x8x8xf32> to vector<2x8xf32>
    %100 = vector.shape_cast %99 : vector<2x8xf32> to vector<2x8x1xf32>
    %101 = tpu.reciprocal %100 {approx = true} : vector<2x8x1xf32> -> vector<2x8x1xf32>
    %102 = vector.broadcast %101 : vector<2x8x1xf32> to vector<2x8x8xf32>
    %103 = arith.mulf %98, %102 : vector<2x8x8xf32>
    %104 = arith.truncf %103 : vector<2x8x8xf32> to vector<2x8x8xbf16>
    %cst_36 = arith.constant dense<0.000000e+00> : vector<2x8x8xf32>
    %105 = tpu.matmul %104, %88, %cst_36 {dimension_numbers = #tpu.dot_dimension_numbers<[2], [1], [1], [2], [0, 0, 0, 1, 1, 2], [0], [0]>} : vector<2x8x8xbf16>, vector<2x8x8xbf16>, vector<2x8x8xf32> -> vector<2x8x8xf32>
    %106 = arith.truncf %105 : vector<2x8x8xf32> to vector<2x8x8xbf16>
    %c0_37 = arith.constant 0 : index
    %c0_38 = arith.constant 0 : index
    %c16 = arith.constant 16 : index
    %107 = vector.load %arg25[%c0_37, %c0_38, %c16] : memref<2x8x32xbf16, #tpu.memory_space<vmem>>, vector<2x8x8xbf16>
    tpu.vector_store %arg25[%c0_37, %c0_38, %c16], %106 {strides = array<i32>} : memref<2x8x32xbf16, #tpu.memory_space<vmem>>, vector<2x8x8xbf16>,
    %108 = vector.extract_strided_slice %38 {offsets = [0, 0, 24], sizes = [2, 8, 8], strides = [1, 1, 1]} : vector<2x8x96xbf16> to vector<2x8x8xbf16>
    %109 = vector.extract_strided_slice %38 {offsets = [0, 0, 56], sizes = [2, 8, 8], strides = [1, 1, 1]} : vector<2x8x96xbf16> to vector<2x8x8xbf16>
    %110 = vector.extract_strided_slice %38 {offsets = [0, 0, 88], sizes = [2, 8, 8], strides = [1, 1, 1]} : vector<2x8x96xbf16> to vector<2x8x8xbf16>
    %cst_39 = arith.constant dense<0.000000e+00> : vector<2x8x8xf32>
    %111 = tpu.matmul %108, %109, %cst_39 {dimension_numbers = #tpu.dot_dimension_numbers<[2], [2], [1], [1], [0, 0, 0, 1, 1, 1], [0], [0]>} : vector<2x8x8xbf16>, vector<2x8x8xbf16>, vector<2x8x8xf32> -> vector<2x8x8xf32>
    %cst_40 = arith.constant -1.000000e+30 : f32
    %112 = vector.shape_cast %41 : vector<1x1x8xi1> to vector<1x1x8xi1>
    %113 = vector.broadcast %112 : vector<1x1x8xi1> to vector<2x8x8xi1>
    %114 = vector.broadcast %cst_40 : f32 to vector<2x8x8xf32>
    %115 = arith.select %113, %111, %114 : vector<2x8x8xi1>, vector<2x8x8xf32>
    %cst_41 = arith.constant dense<0xFF800000> : vector<2x8xf32>
    %116 = vector.multi_reduction <maximumf>, %115, %cst_41 [2] : vector<2x8x8xf32> to vector<2x8xf32>
    %117 = vector.shape_cast %116 : vector<2x8xf32> to vector<2x8x1xf32>
    %118 = vector.broadcast %117 : vector<2x8x1xf32> to vector<2x8x8xf32>
    %119 = arith.subf %115, %118 : vector<2x8x8xf32>
    %120 = math.exp %119 : vector<2x8x8xf32>
    %cst_42 = arith.constant dense<0.000000e+00> : vector<2x8xf32>
    %121 = vector.multi_reduction <add>, %120, %cst_42 [2] : vector<2x8x8xf32> to vector<2x8xf32>
    %122 = vector.shape_cast %121 : vector<2x8xf32> to vector<2x8x1xf32>
    %123 = tpu.reciprocal %122 {approx = true} : vector<2x8x1xf32> -> vector<2x8x1xf32>
    %124 = vector.broadcast %123 : vector<2x8x1xf32> to vector<2x8x8xf32>
    %125 = arith.mulf %120, %124 : vector<2x8x8xf32>
    %126 = arith.truncf %125 : vector<2x8x8xf32> to vector<2x8x8xbf16>
    %cst_43 = arith.constant dense<0.000000e+00> : vector<2x8x8xf32>
    %127 = tpu.matmul %126, %110, %cst_43 {dimension_numbers = #tpu.dot_dimension_numbers<[2], [1], [1], [2], [0, 0, 0, 1, 1, 2], [0], [0]>} : vector<2x8x8xbf16>, vector<2x8x8xbf16>, vector<2x8x8xf32> -> vector<2x8x8xf32>
    %128 = arith.truncf %127 : vector<2x8x8xf32> to vector<2x8x8xbf16>
    %c0_44 = arith.constant 0 : index
    %c0_45 = arith.constant 0 : index
    %c24 = arith.constant 24 : index
    %129 = vector.load %arg25[%c0_44, %c0_45, %c24] : memref<2x8x32xbf16, #tpu.memory_space<vmem>>, vector<2x8x8xbf16>
    tpu.vector_store %arg25[%c0_44, %c0_45, %c24], %128 {strides = array<i32>} : memref<2x8x32xbf16, #tpu.memory_space<vmem>>, vector<2x8x8xbf16>,
    %c0_46 = arith.constant 0 : index
    %c0_47 = arith.constant 0 : index
    %c0_48 = arith.constant 0 : index
    %130 = vector.load %arg25[%c0_46, %c0_47, %c0_48] : memref<2x8x32xbf16, #tpu.memory_space<vmem>>, vector<2x8x32xbf16>
    %131 = vector.shape_cast %130 : vector<2x8x32xbf16> to vector<16x32xbf16>
    %c0_49 = arith.constant 0 : index
    %c0_50 = arith.constant 0 : index
    %c0_51 = arith.constant 0 : index
    %132 = vector.load %arg10[%c0_49, %c0_50, %c0_51] : memref<1x32x32xbf16, #tpu.memory_space<vmem>>, vector<1x32x32xbf16>
    %133 = vector.shape_cast %132 : vector<1x32x32xbf16> to vector<32x32xbf16>
    %cst_52 = arith.constant dense<0.000000e+00> : vector<16x32xf32>
    %134 = tpu.matmul %131, %133, %cst_52 {dimension_numbers = #tpu.dot_dimension_numbers<[1], [0], [0], [1], [0, 0, 1, 1], [], []>} : vector<16x32xbf16>, vector<32x32xbf16>, vector<16x32xf32> -> vector<16x32xf32>
    %135 = vector.shape_cast %134 : vector<16x32xf32> to vector<2x8x32xf32>
    %136 = arith.addf %3, %135 : vector<2x8x32xf32>
    %c0_53 = arith.constant 0 : index
    %c0_54 = arith.constant 0 : index
    %c0_55 = arith.constant 0 : index
    %137 = vector.load %arg11[%c0_53, %c0_54, %c0_55] : memref<1x1x32xf32, #tpu.memory_space<vmem>>, vector<1x1x32xf32>
    %138 = vector.shape_cast %137 : vector<1x1x32xf32> to vector<1x32xf32>
    %c0_56 = arith.constant 0 : index
    %c0_57 = arith.constant 0 : index
    %c0_58 = arith.constant 0 : index
    %139 = vector.load %arg12[%c0_56, %c0_57, %c0_58] : memref<1x1x32xf32, #tpu.memory_space<vmem>>, vector<1x1x32xf32>
    %140 = vector.shape_cast %139 : vector<1x1x32xf32> to vector<1x32xf32>
    %cst_59 = arith.constant dense<0.000000e+00> : vector<2x8xf32>
    %141 = vector.multi_reduction <add>, %136, %cst_59 [2] : vector<2x8x32xf32> to vector<2x8xf32>
    %142 = vector.shape_cast %141 : vector<2x8xf32> to vector<2x8x1xf32>
    %cst_60 = arith.constant 3.200000e+01 : f32
    %143 = vector.broadcast %cst_60 : f32 to vector<2x8x1xf32>
    %144 = arith.divf %142, %143 : vector<2x8x1xf32>
    %145 = vector.broadcast %144 : vector<2x8x1xf32> to vector<2x8x32xf32>
    %146 = arith.subf %136, %145 : vector<2x8x32xf32>
    %147 = arith.mulf %146, %146 : vector<2x8x32xf32>
    %cst_61 = arith.constant dense<0.000000e+00> : vector<2x8xf32>
    %148 = vector.multi_reduction <add>, %147, %cst_61 [2] : vector<2x8x32xf32> to vector<2x8xf32>
    %149 = vector.shape_cast %148 : vector<2x8xf32> to vector<2x8x1xf32>
    %cst_62 = arith.constant 0.0322580636 : f32
    %150 = vector.broadcast %cst_62 : f32 to vector<2x8x1xf32>
    %151 = arith.mulf %149, %150 : vector<2x8x1xf32>
    %152 = math.sqrt %151 : vector<2x8x1xf32>
    %153 = vector.broadcast %144 : vector<2x8x1xf32> to vector<2x8x32xf32>
    %154 = arith.subf %136, %153 : vector<2x8x32xf32>
    %cst_63 = arith.constant 9.99999997E-7 : f32
    %155 = vector.broadcast %cst_63 : f32 to vector<2x8x1xf32>
    %156 = arith.addf %152, %155 : vector<2x8x1xf32>
    %157 = vector.broadcast %156 : vector<2x8x1xf32> to vector<2x8x32xf32>
    %158 = arith.divf %154, %157 : vector<2x8x32xf32>
    %159 = vector.shape_cast %138 : vector<1x32xf32> to vector<1x1x32xf32>
    %160 = vector.broadcast %159 : vector<1x1x32xf32> to vector<2x8x32xf32>
    %161 = arith.mulf %160, %158 : vector<2x8x32xf32>
    %162 = vector.shape_cast %140 : vector<1x32xf32> to vector<1x1x32xf32>
    %163 = vector.broadcast %162 : vector<1x1x32xf32> to vector<2x8x32xf32>
    %164 = arith.addf %161, %163 : vector<2x8x32xf32>
    %165 = arith.truncf %164 : vector<2x8x32xf32> to vector<2x8x32xbf16>
    %166 = vector.shape_cast %165 : vector<2x8x32xbf16> to vector<16x32xbf16>
    %c0_64 = arith.constant 0 : index
    %c0_65 = arith.constant 0 : index
    %c0_66 = arith.constant 0 : index
    %167 = vector.load %arg13[%c0_64, %c0_65, %c0_66] : memref<1x32x64xbf16, #tpu.memory_space<vmem>>, vector<1x32x64xbf16>
    %168 = vector.shape_cast %167 : vector<1x32x64xbf16> to vector<32x64xbf16>
    %cst_67 = arith.constant dense<0.000000e+00> : vector<16x64xf32>
    %169 = tpu.matmul %166, %168, %cst_67 {dimension_numbers = #tpu.dot_dimension_numbers<[1], [0], [0], [1], [0, 0, 1, 1], [], []>} : vector<16x32xbf16>, vector<32x64xbf16>, vector<16x64xf32> -> vector<16x64xf32>
    %c0_68 = arith.constant 0 : index
    %c0_69 = arith.constant 0 : index
    %c0_70 = arith.constant 0 : index
    %170 = vector.load %arg14[%c0_68, %c0_69, %c0_70] : memref<1x1x64xf32, #tpu.memory_space<vmem>>, vector<1x1x64xf32>
    %171 = vector.shape_cast %170 : vector<1x1x64xf32> to vector<1x64xf32>
    %172 = vector.broadcast %171 : vector<1x64xf32> to vector<16x64xf32>
    %173 = arith.addf %169, %172 : vector<16x64xf32>
    %cst_71 = arith.constant 0.000000e+00 : f32
    %174 = vector.broadcast %cst_71 : f32 to vector<16x64xf32>
    %175 = arith.maximumf %173, %174 : vector<16x64xf32>
    %176 = arith.truncf %175 : vector<16x64xf32> to vector<16x64xbf16>
    %c0_72 = arith.constant 0 : index
    %c0_73 = arith.constant 0 : index
    %c0_74 = arith.constant 0 : index
    %177 = vector.load %arg15[%c0_72, %c0_73, %c0_74] : memref<1x64x32xbf16, #tpu.memory_space<vmem>>, vector<1x64x32xbf16>
    %178 = vector.shape_cast %177 : vector<1x64x32xbf16> to vector<64x32xbf16>
    %cst_75 = arith.constant dense<0.000000e+00> : vector<16x32xf32>
    %179 = tpu.matmul %176, %178, %cst_75 {dimension_numbers = #tpu.dot_dimension_numbers<[1], [0], [0], [1], [0, 0, 1, 1], [], []>} : vector<16x64xbf16>, vector<64x32xbf16>, vector<16x32xf32> -> vector<16x32xf32>
    %c0_76 = arith.constant 0 : index
    %c0_77 = arith.constant 0 : index
    %c0_78 = arith.constant 0 : index
    %180 = vector.load %arg16[%c0_76, %c0_77, %c0_78] : memref<1x1x32xf32, #tpu.memory_space<vmem>>, vector<1x1x32xf32>
    %181 = vector.shape_cast %180 : vector<1x1x32xf32> to vector<1x32xf32>
    %182 = vector.broadcast %181 : vector<1x32xf32> to vector<16x32xf32>
    %183 = arith.addf %179, %182 : vector<16x32xf32>
    %184 = vector.shape_cast %183 : vector<16x32xf32> to vector<2x8x32xf32>
    %185 = arith.addf %136, %184 : vector<2x8x32xf32>
    %c0_79 = arith.constant 0 : index
    %c0_80 = arith.constant 0 : index
    %c0_81 = arith.constant 0 : index
    %186 = vector.load %arg24[%c0_79, %c0_80, %c0_81] : memref<2x8x32xf32, #tpu.memory_space<vmem>>, vector<2x8x32xf32>
    tpu.vector_store %arg24[%c0_79, %c0_80, %c0_81], %185 {strides = array<i32>} : memref<2x8x32xf32, #tpu.memory_space<vmem>>, vector<2x8x32xf32>,
    %c1_i32 = arith.constant 1 : i32
    %187 = arith.cmpi eq, %arg1, %c1_i32 : i32
    %188 = arith.extui %187 : i1 to i32
    %c0_i32_82 = arith.constant 0 : i32
    %189 = arith.cmpi ne, %188, %c0_i32_82 : i32
    scf.if %189 {
      %190 = vector.extract_strided_slice %185 {offsets = [0, 0, 0], sizes = [2, 1, 32], strides = [1, 1, 1]} : vector<2x8x32xf32> to vector<2x1x32xf32>
      %191 = vector.shape_cast %190 : vector<2x1x32xf32> to vector<2x32xf32>
      %c0_83 = arith.constant 0 : index
      %c0_84 = arith.constant 0 : index
      %192 = vector.load %arg17[%c0_83, %c0_84] : memref<1x32xf32, #tpu.memory_space<vmem>>, vector<1x32xf32>
      %c0_85 = arith.constant 0 : index
      %c0_86 = arith.constant 0 : index
      %193 = vector.load %arg18[%c0_85, %c0_86] : memref<1x32xf32, #tpu.memory_space<vmem>>, vector<1x32xf32>
      %cst_87 = arith.constant dense<0.000000e+00> : vector<2xf32>
      %194 = vector.multi_reduction <add>, %191, %cst_87 [1] : vector<2x32xf32> to vector<2xf32>
      %195 = vector.shape_cast %194 : vector<2xf32> to vector<2x1xf32>
      %cst_88 = arith.constant 3.200000e+01 : f32
      %196 = vector.broadcast %cst_88 : f32 to vector<2x1xf32>
      %197 = arith.divf %195, %196 : vector<2x1xf32>
      %198 = vector.broadcast %197 : vector<2x1xf32> to vector<2x32xf32>
      %199 = arith.subf %191, %198 : vector<2x32xf32>
      %200 = arith.mulf %199, %199 : vector<2x32xf32>
      %cst_89 = arith.constant dense<0.000000e+00> : vector<2xf32>
      %201 = vector.multi_reduction <add>, %200, %cst_89 [1] : vector<2x32xf32> to vector<2xf32>
      %202 = vector.shape_cast %201 : vector<2xf32> to vector<2x1xf32>
      %cst_90 = arith.constant 0.0322580636 : f32
      %203 = vector.broadcast %cst_90 : f32 to vector<2x1xf32>
      %204 = arith.mulf %202, %203 : vector<2x1xf32>
      %205 = math.sqrt %204 : vector<2x1xf32>
      %206 = vector.broadcast %197 : vector<2x1xf32> to vector<2x32xf32>
      %207 = arith.subf %191, %206 : vector<2x32xf32>
      %cst_91 = arith.constant 9.99999997E-7 : f32
      %208 = vector.broadcast %cst_91 : f32 to vector<2x1xf32>
      %209 = arith.addf %205, %208 : vector<2x1xf32>
      %210 = vector.broadcast %209 : vector<2x1xf32> to vector<2x32xf32>
      %211 = arith.divf %207, %210 : vector<2x32xf32>
      %212 = vector.broadcast %192 : vector<1x32xf32> to vector<2x32xf32>
      %213 = arith.mulf %212, %211 : vector<2x32xf32>
      %214 = vector.broadcast %193 : vector<1x32xf32> to vector<2x32xf32>
      %215 = arith.addf %213, %214 : vector<2x32xf32>
      %c0_92 = arith.constant 0 : index
      %c0_93 = arith.constant 0 : index
      %216 = vector.load %arg19[%c0_92, %c0_93] : memref<1x32xf32, #tpu.memory_space<vmem>>, vector<1x32xf32>
      %c0_94 = arith.constant 0 : index
      %c0_95 = arith.constant 0 : index
      %217 = vector.load %arg20[%c0_94, %c0_95] : memref<1x32xf32, #tpu.memory_space<vmem>>, vector<1x32xf32>
      %cst_96 = arith.constant dense<0.000000e+00> : vector<2xf32>
      %218 = vector.multi_reduction <add>, %215, %cst_96 [1] : vector<2x32xf32> to vector<2xf32>
      %219 = vector.shape_cast %218 : vector<2xf32> to vector<2x1xf32>
      %cst_97 = arith.constant 3.200000e+01 : f32
      %220 = vector.broadcast %cst_97 : f32 to vector<2x1xf32>
      %221 = arith.divf %219, %220 : vector<2x1xf32>
      %222 = vector.broadcast %221 : vector<2x1xf32> to vector<2x32xf32>
      %223 = arith.subf %215, %222 : vector<2x32xf32>
      %224 = arith.mulf %223, %223 : vector<2x32xf32>
      %cst_98 = arith.constant dense<0.000000e+00> : vector<2xf32>
      %225 = vector.multi_reduction <add>, %224, %cst_98 [1] : vector<2x32xf32> to vector<2xf32>
      %226 = vector.shape_cast %225 : vector<2xf32> to vector<2x1xf32>
      %cst_99 = arith.constant 3.200000e+01 : f32
      %227 = vector.broadcast %cst_99 : f32 to vector<2x1xf32>
      %228 = arith.divf %226, %227 : vector<2x1xf32>
      %229 = vector.broadcast %221 : vector<2x1xf32> to vector<2x32xf32>
      %230 = arith.subf %215, %229 : vector<2x32xf32>
      %231 = vector.broadcast %216 : vector<1x32xf32> to vector<2x32xf32>
      %232 = arith.mulf %231, %230 : vector<2x32xf32>
      %cst_100 = arith.constant 9.99999974E-6 : f32
      %233 = vector.broadcast %cst_100 : f32 to vector<2x1xf32>
      %234 = arith.addf %228, %233 : vector<2x1xf32>
      %235 = math.rsqrt %234 : vector<2x1xf32>
      %236 = vector.broadcast %235 : vector<2x1xf32> to vector<2x32xf32>
      %237 = arith.mulf %232, %236 : vector<2x32xf32>
      %238 = vector.broadcast %217 : vector<1x32xf32> to vector<2x32xf32>
      %239 = arith.addf %237, %238 : vector<2x32xf32>
      %240 = arith.truncf %239 : vector<2x32xf32> to vector<2x32xbf16>
      %c0_101 = arith.constant 0 : index
      %c0_102 = arith.constant 0 : index
      %241 = vector.load %arg21[%c0_101, %c0_102] : memref<32x128xbf16, #tpu.memory_space<vmem>>, vector<32x128xbf16>
      %cst_103 = arith.constant dense<0.000000e+00> : vector<2x128xf32>
      %242 = tpu.matmul %240, %241, %cst_103 {dimension_numbers = #tpu.dot_dimension_numbers<[1], [0], [0], [1], [0, 0, 1, 1], [], []>} : vector<2x32xbf16>, vector<32x128xbf16>, vector<2x128xf32> -> vector<2x128xf32>
      %c0_104 = arith.constant 0 : index
      %c0_105 = arith.constant 0 : index
      %243 = vector.load %arg22[%c0_104, %c0_105] : memref<1x128xf32, #tpu.memory_space<vmem>>, vector<1x128xf32>
      %244 = vector.broadcast %243 : vector<1x128xf32> to vector<2x128xf32>
      %245 = arith.addf %242, %244 : vector<2x128xf32>
      %c0_106 = arith.constant 0 : index
      %c0_107 = arith.constant 0 : index
      %c0_108 = arith.constant 0 : index
      %246 = vector.load %arg23[%c0_106, %c0_107, %c0_108] : memref<2x1x128xf32, #tpu.memory_space<vmem>>, vector<2x1x128xf32>
      %247 = vector.shape_cast %246 : vector<2x1x128xf32> to vector<2x128xf32>
      %248 = vector.shape_cast %245 : vector<2x128xf32> to vector<2x1x128xf32>
      tpu.vector_store %arg23[%c0_106, %c0_107, %c0_108], %248 {strides = array<i32>} : memref<2x1x128xf32, #tpu.memory_space<vmem>>, vector<2x1x128xf32>,
    } else {
    }
    return
  }
  func.func @transform_0(%arg0: i32, %arg1: i32) -> (i32, i32, i32) {
    %c0_i32 = arith.constant 0 : i32
    %c0_i32_0 = arith.constant 0 : i32
    %c0_i32_1 = arith.constant 0 : i32
    return %arg0, %c0_i32, %c0_i32_0 : i32, i32, i32
  }
  func.func @transform_1(%arg0: i32, %arg1: i32) -> (i32, i32) {
    %c0_i32 = arith.constant 0 : i32
    %c0_i32_0 = arith.constant 0 : i32
    %c0_i32_1 = arith.constant 0 : i32
    return %c0_i32, %c0_i32_0 : i32, i32
  }
  func.func @transform_2(%arg0: i32, %arg1: i32) -> (i32, i32) {
    %c0_i32 = arith.constant 0 : i32
    %c0_i32_0 = arith.constant 0 : i32
    %c0_i32_1 = arith.constant 0 : i32
    return %c0_i32, %c0_i32_0 : i32, i32
  }
  func.func @transform_3(%arg0: i32, %arg1: i32) -> (i32, i32) {
    %c0_i32 = arith.constant 0 : i32
    %c0_i32_0 = arith.constant 0 : i32
    %c0_i32_1 = arith.constant 0 : i32
    return %c0_i32, %c0_i32_0 : i32, i32
  }
  func.func @transform_4(%arg0: i32, %arg1: i32) -> (i32, i32) {
    %c0_i32 = arith.constant 0 : i32
    %c0_i32_0 = arith.constant 0 : i32
    %c0_i32_1 = arith.constant 0 : i32
    return %c0_i32, %c0_i32_0 : i32, i32
  }
  func.func @transform_5(%arg0: i32, %arg1: i32) -> (i32, i32, i32) {
    %c0_i32 = arith.constant 0 : i32
    %c0_i32_0 = arith.constant 0 : i32
    %c0_i32_1 = arith.constant 0 : i32
    return %arg1, %c0_i32, %c0_i32_0 : i32, i32, i32
  }
  func.func @transform_6(%arg0: i32, %arg1: i32) -> (i32, i32, i32) {
    %c0_i32 = arith.constant 0 : i32
    %c0_i32_0 = arith.constant 0 : i32
    %c0_i32_1 = arith.constant 0 : i32
    return %arg1, %c0_i32, %c0_i32_0 : i32, i32, i32
  }
  func.func @transform_7(%arg0: i32, %arg1: i32) -> (i32, i32, i32) {
    %c0_i32 = arith.constant 0 : i32
    %c0_i32_0 = arith.constant 0 : i32
    %c0_i32_1 = arith.constant 0 : i32
    return %arg1, %c0_i32, %c0_i32_0 : i32, i32, i32
  }
  func.func @transform_8(%arg0: i32, %arg1: i32) -> (i32, i32, i32) {
    %c0_i32 = arith.constant 0 : i32
    %c0_i32_0 = arith.constant 0 : i32
    %c0_i32_1 = arith.constant 0 : i32
    return %arg1, %c0_i32, %c0_i32_0 : i32, i32, i32
  }
  func.func @transform_9(%arg0: i32, %arg1: i32) -> (i32, i32, i32) {
    %c0_i32 = arith.constant 0 : i32
    %c0_i32_0 = arith.constant 0 : i32
    %c0_i32_1 = arith.constant 0 : i32
    return %arg1, %c0_i32, %c0_i32_0 : i32, i32, i32
  }
  func.func @transform_10(%arg0: i32, %arg1: i32) -> (i32, i32, i32) {
    %c0_i32 = arith.constant 0 : i32
    %c0_i32_0 = arith.constant 0 : i32
    %c0_i32_1 = arith.constant 0 : i32
    return %arg1, %c0_i32, %c0_i32_0 : i32, i32, i32
  }
  func.func @transform_11(%arg0: i32, %arg1: i32) -> (i32, i32, i32) {
    %c0_i32 = arith.constant 0 : i32
    %c0_i32_0 = arith.constant 0 : i32
    %c0_i32_1 = arith.constant 0 : i32
    return %arg1, %c0_i32, %c0_i32_0 : i32, i32, i32
  }
  func.func @transform_12(%arg0: i32, %arg1: i32) -> (i32, i32, i32) {
    %c0_i32 = arith.constant 0 : i32
    %c0_i32_0 = arith.constant 0 : i32
    %c0_i32_1 = arith.constant 0 : i32
    return %arg1, %c0_i32, %c0_i32_0 : i32, i32, i32
  }
  func.func @transform_13(%arg0: i32, %arg1: i32) -> (i32, i32, i32) {
    %c0_i32 = arith.constant 0 : i32
    %c0_i32_0 = arith.constant 0 : i32
    %c0_i32_1 = arith.constant 0 : i32
    return %arg1, %c0_i32, %c0_i32_0 : i32, i32, i32
  }
  func.func @transform_14(%arg0: i32, %arg1: i32) -> (i32, i32, i32) {
    %c0_i32 = arith.constant 0 : i32
    %c0_i32_0 = arith.constant 0 : i32
    %c0_i32_1 = arith.constant 0 : i32
    return %arg1, %c0_i32, %c0_i32_0 : i32, i32, i32
  }
  func.func @transform_15(%arg0: i32, %arg1: i32) -> (i32, i32) {
    %c0_i32 = arith.constant 0 : i32
    %c0_i32_0 = arith.constant 0 : i32
    %c0_i32_1 = arith.constant 0 : i32
    return %c0_i32, %c0_i32_0 : i32, i32
  }
  func.func @transform_16(%arg0: i32, %arg1: i32) -> (i32, i32) {
    %c0_i32 = arith.constant 0 : i32
    %c0_i32_0 = arith.constant 0 : i32
    %c0_i32_1 = arith.constant 0 : i32
    return %c0_i32, %c0_i32_0 : i32, i32
  }
  func.func @transform_17(%arg0: i32, %arg1: i32) -> (i32, i32) {
    %c0_i32 = arith.constant 0 : i32
    %c0_i32_0 = arith.constant 0 : i32
    %c0_i32_1 = arith.constant 0 : i32
    return %c0_i32, %c0_i32_0 : i32, i32
  }
  func.func @transform_18(%arg0: i32, %arg1: i32) -> (i32, i32) {
    %c0_i32 = arith.constant 0 : i32
    %c0_i32_0 = arith.constant 0 : i32
    %c0_i32_1 = arith.constant 0 : i32
    return %c0_i32, %c0_i32_0 : i32, i32
  }
  func.func @transform_19(%arg0: i32, %arg1: i32) -> (i32, i32) {
    %c0_i32 = arith.constant 0 : i32
    %c0_i32_0 = arith.constant 0 : i32
    %c0_i32_1 = arith.constant 0 : i32
    return %c0_i32, %c0_i32_0 : i32, i32
  }
  func.func @transform_20(%arg0: i32, %arg1: i32) -> (i32, i32) {
    %c0_i32 = arith.constant 0 : i32
    %c0_i32_0 = arith.constant 0 : i32
    %c0_i32_1 = arith.constant 0 : i32
    return %c0_i32, %c0_i32_0 : i32, i32
  }
  func.func @transform_21(%arg0: i32, %arg1: i32) -> (i32, i32, i32) {
    %c0_i32 = arith.constant 0 : i32
    %c0_i32_0 = arith.constant 0 : i32
    %c0_i32_1 = arith.constant 0 : i32
    return %arg0, %c0_i32, %c0_i32_0 : i32, i32, i32
  }
}

</mosaic_0001>

<bundles_post_ra>
// kernel: tpu_custom_call.1
= control target key start
LH: loop header
LB: loop body
LE: loop exit
PB: predicated region body
PF: predicated region fallthrough
CT: control target
= control target key end

     0   :  { %s3266_s0 = inlined_call_operand.vmem [shape: bf16[4,4,192], index: 0, kind: input, shape index: {}]   ;;  %s3267_s1 = inlined_call_operand.vmem [shape: bf16[192,32], index: 1, kind: input, shape index: {}]   ;;  %s3268_s2 = inlined_call_operand.vmem [shape: f32[1,32], index: 2, kind: input, shape index: {}]   ;;  %s3269_s3 = inlined_call_operand.vmem [shape: f32[1,32], index: 3, kind: input, shape index: {}]   ;;  %s3270_s4 = inlined_call_operand.vmem [shape: f32[8,32], index: 4, kind: input, shape index: {}]   ;;  %s3271_s5 = inlined_call_operand.vmem [shape: f32[2,1,32], index: 5, kind: input, shape index: {}]   ;;  %s3272_s6 = inlined_call_operand.vmem [shape: f32[2,1,32], index: 6, kind: input, shape index: {}]   ;;  %s3273_s7 = inlined_call_operand.vmem [shape: bf16[2,32,96], index: 7, kind: input, shape index: {}]   ;;  %s3274_s8 = inlined_call_operand.vmem [shape: bf16[2,32,32], index: 8, kind: input, shape index: {}]   ;;  %s3275_s9 = inlined_call_operand.vmem [shape: f32[2,1,32], index: 9, kind: input, shape index: {}]   ;;  %s3276_s10 = inlined_call_operand.vmem [shape: f32[2,1,32], index: 10, kind: input, shape index: {}]   ;;  %s3277_s11 = inlined_call_operand.vmem [shape: bf16[2,32,64], index: 11, kind: input, shape index: {}]   ;;  %s3278_s12 = inlined_call_operand.vmem [shape: f32[2,1,64], index: 12, kind: input, shape index: {}]   ;;  %s3279_s13 = inlined_call_operand.vmem [shape: bf16[2,64,32], index: 13, kind: input, shape index: {}]   ;;  %s3280_s14 = inlined_call_operand.vmem [shape: f32[2,1,32], index: 14, kind: input, shape index: {}]   ;;  %s3281_s15 = inlined_call_operand.vmem [shape: f32[1,32], index: 15, kind: input, shape index: {}]   ;;  %s3282_s16 = inlined_call_operand.vmem [shape: f32[1,32], index: 16, kind: input, shape index: {}]   ;;  %s3283_s17 = inlined_call_operand.vmem [shape: f32[1,32], index: 17, kind: input, shape index: {}]   ;;  %s3284_s18 = inlined_call_operand.vmem [shape: f32[1,32], index: 18, kind: input, shape index: {}]   ;;  %s3285_s19 = inlined_call_operand.vmem [shape: bf16[32,128], index: 19, kind: input, shape index: {}]   ;;  %s3286_s20 = inlined_call_operand.vmem [shape: f32[1,128], index: 20, kind: input, shape index: {}]   ;;  %s3287_s21 = inlined_call_operand.hbm [shape: f32[4,1,128], index: 21, kind: output, shape index: {}]  }
   0x1   :  { %3305 = sst [smem:[#allocation19_spill]] %s3266_s0 }
   0x2   :  { %3306 = sst [smem:[#allocation20_spill]] %s3267_s1 }
   0x3   :  { %3307 = sst [smem:[#allocation21_spill]] %s3268_s2 }
   0x4   :  { %3308 = sst [smem:[#allocation22_spill]] %s3269_s3 }
   0x5   :  { %3309 = sst [smem:[#allocation23_spill]] %s3270_s4 }
   0x6   :  { %3310 = sst [smem:[#allocation24_spill]] %s3271_s5 }
   0x7   :  { %3311 = sst [smem:[#allocation25_spill]] %s3273_s7 }
   0x8   :  { %3312 = sst [smem:[#allocation26_spill]] %s3281_s15 }
   0x9   :  { %3313 = sst [smem:[#allocation27_spill]] %s3282_s16 }
   0xa   :  { %3314 = sst [smem:[#allocation28_spill]] %s3283_s17 }
   0xb   :  { %3315 = sst [smem:[#allocation29_spill]] %s3284_s18 }
   0xc   :  { %3316 = sst [smem:[#allocation30_spill]] %s3285_s19 }
   0xd   :  { %3317 = sst [smem:[#allocation31_spill]] %s3286_s20 }
   0xe   :  { %3318 = sst [smem:[#allocation32_spill]] %s3287_s21 }
   0xf   :  { %26 = vsyncpa [#allocation5], 0 }
  0x10   :  { %28 = vsyncpa [#allocation5 + $0x1], 0  ;;  %s2797_s2 = smov 0   ;;  %s2799_s25 = smov 0  }
  0x11   :  { %s2801_s26 = smov 0   ;;  %s2803_s27 = smov 0  }
  0x12   :  { %s2805_s3 = smov 0   ;;  %s2807_s28 = smov 0  }
  0x13   :  { %s2809_s29 = smov 0   ;;  %s2811_s0 = smov 0  }
  0x14 LB: > { %3319 = sst [smem:[#allocation7_spill]] %s2640_s2  ;;  %s2241_s4 = sadd.s32 4294967295, %s2668_s0   ;;  %s2668_s0 = sphi %s2811_s0, %s34_s0   ;;  %s2664_s29 = sphi %s2809_s29, %s3367_s29   ;;  %s2660_s28 = sphi %s2807_s28, %s3366_s28   ;;  %s2656_s3 = sphi %s2805_s3, %s3365_s3   ;;  %s2652_s27 = sphi %s2803_s27, %s3364_s27   ;;  %s2648_s26 = sphi %s2801_s26, %s3363_s26   ;;  %s2644_s25 = sphi %s2799_s25, %s3362_s25   ;;  %s2640_s2 = sphi %s2797_s2, %s3361_s2  }
  0x15   : > { %3320 = sst [smem:[#allocation8_spill]] %s2644_s25  ;;  %s2242_s30 = sadd.s32 4294967294, %s2668_s0  }
  0x16   : > { %3321 = sst [smem:[#allocation9_spill]] %s2648_s26  ;;  %s43_s5 = sadd.s32 1, %s2660_s28 }
  0x17   : > { %3322 = sst [smem:[#allocation10_spill]] %s2660_s28  ;;  %p44_p0 = scmp.ge.s32.totalorder %s43_s5, 2 }
  0x18   : > { %3323 = sst [smem:[#allocation11_spill]] %s2664_s29  ;;  %s46_s22 = sadd.s32 1, %s2664_s29 }
  0x19   : > { %3324 = sst [smem:[#allocation12_spill]] %s2668_s0  ;;  %p559_p1 = scmp.ne.s32.totalorder %s2648_s26, %s2644_s25 }
  0x1a   : > { %p560_p2 = scmp.eq.s32.totalorder %s2241_s4, 3  ;;  %s3369_s5 = smov (%p44_p0, %s43_s5), 0 }
  0x1b   : > { %3325 = sst [smem:[#allocation13_spill]] %s3369_s5  ;;  %s3371_s22 = smov (!%p44_p0, %s46_s22), %s2664_s29 }
  0x1c   : > { %p2844_p3 = por %p560_p2, %p559_p1  ;;  %p565_p4 = scmp.ne.s32.totalorder %s2644_s25, %s2640_s2 }
  0x1d   : > { %p48_p5 = scmp.ge.s32.totalorder %s3371_s22, 2  ;;  %p566_p6 = scmp.eq.s32.totalorder %s2242_s30, 3 }
  0x1e   : > { %s3326_s23 = scalar_select %p2844_p3, 1, 0 }
  0x1f   : > { %p2245_p7 = scmp.ge.s32.totalorder %s2668_s0, 1  ;;  %p692_p8 = scmp.lt.s32.totalorder %s2668_s0, 5 }
  0x20   : > { %3327 = sst [smem:[#allocation14_spill]] %s3326_s23  ;;  %s3373_s22 = smov (%p48_p5, %s3371_s22), 0 }
  0x21   : > { %3328 = sst [smem:[#allocation15_spill]] %s3373_s22  ;;  %p2854_p9 = por %p566_p6, %p565_p4 }
  0x22   : > { %p693_p10 = pnand %p2245_p7, %p692_p8  ;;  %s546_s24 = ssub.s32 %s2664_s29, %s3373_s22 }
  0x23   : > { %s3329_s1 = scalar_select %p2854_p9, 1, 0 }
  0x24   : > { %s549_s4 = sadd.s32 1, %s2648_s26  ;;  %p547_p11 = scmp.eq.s32.totalorder %s546_s24, 0 }
  0x25   : > { %3330 = sst [smem:[#allocation16_spill]] %s3329_s1  ;;  %696 = sbr.rel (%p693_p10) target bundleno = 2985 (0xba9), region = 104 }
  0x26   : > { %s2862_s5 = scalar_select %p547_p11, %s2648_s26, %s549_s4  }
  0x28   : > { %3331 = sst [smem:[#allocation17_spill]] %s2862_s5 }
  0x2a   : > { %s3296_s30 = sand.u32 1, %s2644_s25   ;;  %s2865_s28 = sshll.u32 %s2656_s3, 1 }
  0x2b   : > { %3332 = sst [smem:[#allocation18_spill]] %s2865_s28  ;;  %s2246_s2 = sshll.u32 %s3296_s30, 1 }
  0x2c   : > { %p792_p12 = scmp.lt.s32.totalorder %s2865_s28, 3  ;;  %p798_p13 = scmp.lt.s32.totalorder %s2652_s27, 1 }
  0x2d   : > { %s3333_s29 = sld [smem:[#allocation19_spill]]  ;;  %s2924_s0 = scalar_lea.vmem [#allocation4], %s2246_s2 }
  0x2e   : > { %s793_s1 = scalar_select %p792_p12, %s2865_s28, 3 }
  0x2f   : > { %s2873_s22 = scalar_select %p798_p13, %s2652_s27, 1 }
  0x30   : > { %s2386_s24 = sshll.u32 %s793_s1, 2  ;;  %s3335_s7 = sld [smem:[#allocation25_spill]] }
  0x31   : > { %s2387_s20 = sshll.u32 %s2873_s22, 4  ;;  %s827_s28 = scalar_lea.vmem %s3278_s12, %s2873_s22 }
  0x32   : > { %s2895_s15 = scalar_lea.vmem %s3274_s8, %s2387_s20  ;;  %s2908_s4 = scalar_lea.vmem %s3277_s11, %s2387_s20 }
  0x33   : > { %s796_s5 = scalar_lea.vmem %s3333_s29, %s2386_s24  ;;  %s2390_s16 = sshll.u32 %s2873_s22, 5 }
  0x34   : > { %s2922_s26 = scalar_lea.vmem %s3279_s13, %s2390_s16  ;;  %p2258_p0 = scmp.ne.s32.totalorder %s2652_s27, 0 }
  0x35   : > { %s3336_s25 = sld [smem:[#allocation20_spill]] (!%p2258_p0) }
  0x36   : > { %s2890_s19 = scalar_lea.vmem %s3335_s7, %s2387_s20  ;;  %s835_s7 = scalar_lea.vmem %s3280_s14, %s2873_s22 }
  0x37   : > { %841 = sbr.rel (%p2258_p0) target bundleno = 227 (0xe3), region = 108  ;;  %s3339_s17 = sld [smem:[#allocation23_spill]] (!%p2258_p0) }
  0x38   : > { %s3340_s16 = sld [smem:[#allocation21_spill]] (!%p2258_p0) }
  0x3b   : > { %s3337_s21 = smov (!%p2258_p0), %s3336_s25 }
  0x3c   : > { %v2398_v0 = vld [vmem:[%s3336_s25 + $0x38] sm:$0xff]  ;;  %v2397_v2 = vld [vmem:[%s3337_s21 + $0x30] sm:$0xff]  ;;  %v842_v4 = vld [vmem:[%s796_s5] sm:$0xf]  ;;  %vm952_vm0 = vcmask 523264   ;;  %s3338_s25 = sld [smem:[#allocation22_spill]] }
  0x3d   : > { %v2402_v1 = vld [vmem:[%s3337_s21 + $0x58] sm:$0xff]  ;;  %955 = vmatpush.bf16.msra.mxu0 %v2398_v0  ;;  %v2401_v3 = vld [vmem:[%s3337_s21 + $0x50] sm:$0xff]  ;;  %v843_v5 = vld [vmem:[%s796_s5 + $0x4] sm:$0xf]  ;;  %873 = vst [vmem:[#allocation1] ss:$4 sm:$0xff] %v842_v4 }
  0x3e   : > { %972 = vmatpush.bf16.msra.mxu1 %v2402_v1  ;;  %876 = vst [vmem:[#allocation1 + $0x1] ss:$4 sm:$0xff] %v843_v5  ;;  %v2396_v6 = vld [vmem:[%s3337_s21 + $0x28] sm:$0xff]  ;;  %v2395_v8 = vld [vmem:[%s3337_s21 + $0x20] sm:$0xff]  ;;  %v2394_v10 = vld [vmem:[%s3337_s21 + $0x18] sm:$0xff]  ;;  %vm990_vm1 = vcmask 253952  }
  0x3f   : > { %v2400_v7 = vld [vmem:[%s3337_s21 + $0x48] sm:$0xff]  ;;  %v2399_v9 = vld [vmem:[%s3337_s21 + $0x40] sm:$0xff]  ;;  %v2393_v12 = vld [vmem:[%s3337_s21 + $0x10] sm:$0xff]  ;;  %vm996_vm2 = vcmask 256000   ;;  %v2670_v19 = vmov 0.0   ;;  %vm993_vm3 = vcmask 257024  }
  0x40   : > { %v2392_v13 = vld [vmem:[%s3337_s21 + $0x8] sm:$0xff]  ;;  %v2391_v14 = vld [vmem:[%s3337_s21] sm:$0xff]  ;;  %997 = vst.msk [vmem:[#allocation2 + $0x5] sm:$0x7] %vm996_vm2, %v2670_v19 }
  0x41   : > { %956 = vmatpush.bf16.msra.mxu0 %v2397_v2  ;;  %v988_v17 = vld [vmem:[%s3339_s17] sm:$0x1]  ;;  %998 = vst.msk [vmem:[#allocation2 + $0xd] sm:$0x7] %vm996_vm2, %v2670_v19  ;;  %v984_v25 = vld [vmem:[%s3339_s17 + $0x1] sm:$0xf] }
  0x42   : > { %973 = vmatpush.bf16.msra.mxu1 %v2401_v3  ;;  %v987_v16 = vld [vmem:[%s3338_s25] sm:$0x1] }
  0x43   : > { %v989_v18 = vadd.f32 %v988_v17, %v987_v16  ;;  %v2504_v22 = vld [vmem:[%s3340_s16] ss:$0 sm:$0xff] }
  0x45   : > { %957 = vmatpush.bf16.msra.mxu0 %v2396_v6  ;;  %v878_v11 = vld.sshfl [vmem:[#allocation1 + $0x8] sm:$0xff pattern:$0x73625140]  ;;  %v877_v15 = vld.sshfl [vmem:[#allocation1] sm:$0xff pattern:$0x73625140] }
  0x46   : > { %974 = vmatpush.bf16.msra.mxu1 %v2400_v7  ;;  %991 = vst.msk [vmem:[#allocation2] sm:$0x1] %vm990_vm1, %v989_v18 }
  0x47   : > { %992 = vst.msk [vmem:[#allocation2 + $0x8] sm:$0x1] %vm990_vm1, %v989_v18 }
  0x49   : > { %958 = vmatpush.bf16.msra.mxu0 %v2395_v8 }
  0x4a   : > { %975 = vmatpush.bf16.msra.mxu1 %v2399_v9 }
  0x4d   : > { %959 = vmatpush.bf16.msra.mxu0 %v2394_v10  ;;  %2307 = vmatmul.msk.bf16.vlgmr.msra.gmra.mxu1 %vm952_vm0, %v878_v11 }
  0x51   : > { %960 = vmatpush.bf16.msra.mxu0 %v2393_v12 }
  0x55   : > { %961 = vmatpush.bf16.msra.mxu0 %v2392_v13 }
  0x59   : > { %962 = vmatpush.bf16.msra.mxu0 %v2391_v14 }
  0x5c   : > { %963 = vmatmul.bf16.vlgmr.msra.gmra.mxu0 %v877_v15 }
  0xca   : > { %v977_v20 = vpop.f32.mrf.mxu1 }
  0xd2   : > { %v979_v21 = vpop.f32.mrf.mxu1 }
  0xd9   : > { %v964_v23 = vpop.f32.mrf.mxu0 }
  0xda   : > { %v965_v24 = vadd.f32 %v2504_v22, %v964_v23 }
  0xdc   : > { %v978_v26 = vadd.f32 %v977_v20, %v965_v24 }
  0xde   : > { %v982_v27 = vrot.slane %v978_v26, 4  ;;  %v985_v28 = vadd.f32 %v984_v25, %v978_v26 }
  0xe0   : > { %v986_v29 = vadd.f32 %v984_v25, %v982_v27  ;;  %994 = vst.msk [vmem:[#allocation2 + $0x1] sm:$0xf] %vm993_vm3, %v985_v28 }
  0xe1   : > { %v966_v30 = vpop.f32.mrf.mxu0 }
  0xe2   : > { %995 = vst.msk [vmem:[#allocation2 + $0x9] sm:$0xf] %vm993_vm3, %v986_v29 }
  0xe3 PF: > { %vm1003_vm4 = vcmask 261120   ;;  %v2671_v35 = vmov 32.0   ;;  %v2404_v52 = vld [vmem:[%s2890_s19 + $0x8] sm:$0xff]  ;;  %v2403_v55 = vld [vmem:[%s2890_s19] sm:$0xff]  ;;  %s3341_s24 = sld [smem:[#allocation24_spill]]  ;;  %s3343_s3 = scalar_lea.vmem %s3272_s6, %s2873_s22  ;;  %vm1147_vm2 = vcmask 64512  }
  0xe4   : > { %2511 = vrcp.f32 %v2671_v35  ;;  %1129 = vmatpush.bf16.msra.mxu0 %v2404_v52  ;;  %s2672_s5 = smov 88   ;;  %s2673_s23 = smov 96  }
  0xe5   : > { %s2674_s18 = smov 80   ;;  %s2675_s16 = smov 72  }
  0xe6   : > { %s2676_s2 = smov 112   ;;  %s2677_s1 = smov 120  }
  0xe7   : > { %v2975_v31 = vld [vmem:[#allocation2] sm:$0xff]  ;;  %s2678_s19 = smov 104   ;;  %s2679_s29 = smov 64  }
  0xe8   : > { %v1004_v32 = vsel %vm1003_vm4, %v2975_v31, 0.0  ;;  %1130 = vmatpush.bf16.msra.mxu0 %v2403_v55  ;;  %s2682_s30 = smov 40   ;;  %s2683_s25 = smov 8  }
  0xe9   : > { %1005 = vadd.xlane.f32.xlu0 %v1004_v32  ;;  %v2979_v33 = vld [vmem:[#allocation2 + $0x8] sm:$0xff]  ;;  %s3342_s20 = scalar_lea.vmem %s3341_s24, %s2873_s22  ;;  %s2680_s24 = smov 56  }
  0xea   : > { %v1007_v34 = vsel %vm1003_vm4, %v2979_v33, 0.0  ;;  %v2512_v36 = vpop.eup %2511  ;;  %v2505_v30 = vld [vmem:[%s3342_s20] ss:$0 sm:$0xff]  ;;  %s2681_s20 = smov 48   ;;  %p2372_p1 = scmp.ne.s32.totalorder %s2652_s27, 1 }
  0xeb   : > { %v1011_v37 = vmul.f32 32.0, %v2512_v36  ;;  %vm1015_vm5 = vweird.f32 %v2512_v36 }
  0xed   : > { %v1012_v38 = vsub.f32 1.0, %v1011_v37 }
  0xef   : > { %v1013_v39 = vmul.f32 %v2512_v36, %v1012_v38  ;;  %v2506_v38 = vld [vmem:[%s3343_s3] ss:$0 sm:$0xff]  ;;  %s2684_s3 = smov 16  }
  0xf1   : > { %1008 = vadd.xlane.f32.xlu0 %v1007_v34  ;;  %v1014_v40 = vadd.f32 %v2512_v36, %v1013_v39 }
  0xf3   : > { %v2983_v41 = vsel %vm1015_vm5, %v2512_v36, %v1014_v40  ;;  %vm1224_vm5 = vcmask 1043456  }
 0x15c   : > { %v1006_v42 = vpop.xlane.xlu0 %1005 }
 0x15d   : > { %v1017_v43 = vmul.f32 %v2983_v41, %v1006_v42 }
 0x15f   : > { %v2987_v44 = vsub.f32 %v2975_v31, %v1017_v43 }
 0x161   : > { %v1021_v45 = vmul.f32 %v2987_v44, %v2987_v44 }
 0x163   : > { %v1023_v46 = vsel %vm1003_vm4, %v1021_v45, 0.0 }
 0x164   : > { %1024 = vadd.xlane.f32.xlu1 %v1023_v46  ;;  %v1009_v47 = vpop.xlane.xlu0 %1008 }
 0x165   : > { %v1018_v48 = vmul.f32 %v2983_v41, %v1009_v47 }
 0x167   : > { %v2994_v49 = vsub.f32 %v2979_v33, %v1018_v48 }
 0x169   : > { %v1022_v50 = vmul.f32 %v2994_v49, %v2994_v49 }
 0x16b   : > { %v1026_v51 = vsel %vm1003_vm4, %v1022_v50, 0.0 }
 0x16c   : > { %1027 = vadd.xlane.f32.xlu1 %v1026_v51 }
 0x1d7   : > { %v1025_v53 = vpop.xlane.xlu1 %1024 }
 0x1d8   : > { %v1029_v54 = vmul.f32 0.032258064, %v1025_v53 }
 0x1da   : > { %2513 = vrsqrt.f32 %v1029_v54  ;;  %vm1038_vm6 = vcmp.eq.f32.partialorder %v1029_v54, inf  ;;  %v1041_v4 = vand.u32 2147483648, %v1029_v54  ;;  %vm1040_vm7 = vcmp.eq.f32.partialorder %v1029_v54, 0.0 }
 0x1df   : > { %v1028_v56 = vpop.xlane.xlu1 %1027 }
 0x1e0   : > { %v2514_v57 = vpop.eup %2513  ;;  %v1030_v58 = vmul.f32 0.032258064, %v1028_v56 }
 0x1e1   : > { %v1032_v59 = vmul.f32 %v2514_v57, %v1029_v54 }
 0x1e2   : > { %2515 = vrsqrt.f32 %v1030_v58  ;;  %vm1050_vm8 = vcmp.eq.f32.partialorder %v1030_v58, inf  ;;  %v1053_v12 = vand.u32 2147483648, %v1030_v58  ;;  %vm1052_vm9 = vcmp.eq.f32.partialorder %v1030_v58, 0.0 }
 0x1e3   : > { %v1033_v60 = vmul.f32 %v2514_v57, %v1032_v59 }
 0x1e5   : > { %v1034_v61 = vmul.f32 0.5, %v1033_v60 }
 0x1e7   : > { %v1035_v62 = vsub.f32 1.5, %v1034_v61 }
 0x1e8   : > { %v2516_v63 = vpop.eup %2515 }
 0x1e9   : > { %v1036_v0 = vmul.f32 %v2514_v57, %v1035_v62  ;;  %v1044_v1 = vmul.f32 %v2516_v63, %v1030_v58 }
 0x1eb   : > { %v1037_v2 = vmul.f32 %v1036_v0, %v1029_v54  ;;  %v1045_v3 = vmul.f32 %v2516_v63, %v1044_v1 }
 0x1ed   : > { %v1039_v5 = vsel %vm1038_vm6, %v1029_v54, %v1037_v2  ;;  %v1046_v6 = vmul.f32 0.5, %v1045_v3  ;;  %vm1264_vm6 = vcmask 60416  }
 0x1ee   : > { %v1042_v7 = vsel %vm1040_vm7, %v1041_v4, %v1039_v5  ;;  %vm1391_vm7 = vcmask 126016  }
 0x1ef   : > { %v1047_v8 = vsub.f32 1.5, %v1046_v6  ;;  %v1055_v9 = vadd.f32 1e-06, %v1042_v7 }
 0x1f1   : > { %v1048_v10 = vmul.f32 %v2516_v63, %v1047_v8  ;;  %2517 = vrcp.f32 %v1055_v9  ;;  %v1068_v19 = vand.u32 2147483648, %v1055_v9  ;;  %v1066_v21 = vand.u32 2147483647, %v1055_v9 }
 0x1f2   : > { %vm1062_vm11 = vweird.f32 %v1055_v9 }
 0x1f3   : > { %v1049_v11 = vmul.f32 %v1048_v10, %v1030_v58  ;;  %v1069_v24 = vor.u32 1.1754944e-38, %v1068_v19  ;;  %vm1067_vm13 = vcmp.eq.f32.partialorder %v1066_v21, 8.507059e+37 }
 0x1f5   : > { %v1051_v13 = vsel %vm1050_vm8, %v1030_v58, %v1049_v11  ;;  %vm1518_vm8 = vcmask 191616  }
 0x1f6   : > { %v1054_v14 = vsel %vm1052_vm9, %v1053_v12, %v1051_v13  ;;  %vm1645_vm9 = vcmask 257216  }
 0x1f7   : > { %v2518_v15 = vpop.eup %2517  ;;  %v1056_v16 = vadd.f32 1e-06, %v1054_v14 }
 0x1f8   : > { %v1058_v17 = vmul.f32 %v2518_v15, %v1055_v9  ;;  %vm1063_vm10 = vweird.f32 %v2518_v15 }
 0x1f9   : > { %2519 = vrcp.f32 %v1056_v16  ;;  %vm1064_vm12 = vmor %vm1062_vm11, %vm1063_vm10  ;;  %v1083_v32 = vand.u32 2147483648, %v1056_v16  ;;  %v1081_v35 = vand.u32 2147483647, %v1056_v16  ;;  %vm1077_vm15 = vweird.f32 %v1056_v16 }
 0x1fa   : > { %v1059_v18 = vsub.f32 1.0, %v1058_v17 }
 0x1fb   : > { %v1084_v39 = vor.u32 1.1754944e-38, %v1083_v32  ;;  %vm1082_vm1 = vcmp.eq.f32.partialorder %v1081_v35, 8.507059e+37 }
 0x1fc   : > { %v1060_v20 = vmul.f32 %v2518_v15, %v1059_v18  ;;  %v1139_v18 = vlaneseq }
 0x1fe   : > { %v1061_v22 = vadd.f32 %v2518_v15, %v1060_v20  ;;  %v1140_v19 = vand.u32 127, %v1139_v18 }
 0x1ff   : > { %v2520_v23 = vpop.eup %2519 }
 0x200   : > { %v1065_v25 = vsel %vm1064_vm12, %v2518_v15, %v1061_v22  ;;  %v1073_v26 = vmul.f32 %v2520_v23, %v1056_v16  ;;  %vm1078_vm14 = vweird.f32 %v2520_v23  ;;  %vm1141_vm3 = vcmp.lt.s32.totalorder %v1140_v19, 5 }
 0x201   : > { %v1070_v27 = vsel %vm1067_vm13, %v1069_v24, %v1065_v25  ;;  %vm1079_vm0 = vmor %vm1077_vm15, %vm1078_vm14 }
 0x202   : > { %v1071_v28 = vmul.f32 %v1070_v27, %v2987_v44  ;;  %v1074_v29 = vsub.f32 1.0, %v1073_v26 }
 0x204   : > { %v1075_v34 = vmul.f32 %v2520_v23, %v1074_v29  ;;  %v1090_v37 = vmul.f32 %v2505_v30, %v1071_v28 }
 0x206   : > { %v1076_v36 = vadd.f32 %v2520_v23, %v1075_v34  ;;  %v1095_v44 = vadd.f32 %v2506_v38, %v1090_v37 }
 0x208   : > { %v1080_v40 = vsel %vm1079_vm0, %v2520_v23, %v1076_v36  ;;  %v1097_v47 = vpack.c.bf16 %v1095_v44, %v1095_v44 }
 0x209   : > { %v1085_v42 = vsel %vm1082_vm1, %v1084_v39, %v1080_v40 }
 0x20a   : > { %v1086_v43 = vmul.f32 %v1085_v42, %v2994_v49  ;;  %v1105_v50 = vunpack.c.l.b16 %v1097_v47 }
 0x20c   : > { %v1091_v45 = vmul.f32 %v2505_v30, %v1086_v43 }
 0x20e   : > { %v1096_v46 = vadd.f32 %v2506_v38, %v1091_v45 }
 0x210   : > { %v1098_v48 = vpack.c.bf16 %v1096_v46, %v1096_v46 }
 0x212   : > { %v1106_v51 = vunpack.c.l.b16 %v1098_v48 }
 0x214   : > { %v1107_v52 = vpack.c.b16 %v1106_v51, %v1105_v50 }
 0x216   : > { %2316 = vmatmul.msk.bf16.vlgmr.msra.gmra.mxu0 %vm1003_vm4, %v1107_v52 }
 0x293   : > { %v1132_v53 = vpop.f32.mrf.mxu0 }
 0x294   : > { %v1137_v54 = vpack.c.bf16 %v1132_v53, %v1132_v53 }
 0x296   : > { %v1143_v55 = vunpack.c.l.b16 %v1137_v54 }
 0x298   : > { %v3014_v56 = vpack.c.b16 %v1143_v55, %v1143_v55 }
 0x29a   : > { %1269 = vrot.lane.b32.xlu0 %v3014_v56, %s2672_s5  ;;  %1145 = vrot.lane.b32.xlu2 %v3014_v56, %s2673_s23 }
 0x29b   : > { %v1134_v49 = vpop.f32.mrf.mxu0 }
 0x29c   : > { %v1138_v57 = vpack.c.bf16 %v1134_v49, %v1134_v49 }
 0x29e   : > { %v1168_v58 = vunpack.c.l.b16 %v1138_v57 }
 0x2a0   : > { %v3018_v59 = vpack.c.b16 %v1168_v58, %v1168_v58 }
 0x2a2   : > { %1419 = vrot.lane.b32.xlu0 %v3018_v59, %s2674_s18  ;;  %1292 = vrot.lane.b32.xlu1 %v3018_v59, %s2672_s5  ;;  %s2685_s5 = smov 24  }
 0x2a3   : > { %1170 = vrot.lane.b32.xlu2 %v3018_v59, %s2673_s23  ;;  %s3344_s23 = scalar_lea.vmem %s3275_s9, %s2873_s22 }
 0x2aa   : > { %1523 = vrot.lane.b32.xlu0 %v3014_v56, %s2675_s16  ;;  %1417 = vrot.lane.b32.xlu1 %v3018_v59, %s2676_s2 }
 0x2ab   : > { %1267 = vrot.lane.b32.xlu2 %v3014_v56, %s2677_s1 }
 0x2b2   : > { %1544 = vrot.lane.b32.xlu0 %v3018_v59, %s2678_s19  ;;  %1521 = vrot.lane.b32.xlu1 %v3014_v56, %s2678_s19  ;;  %s3350_s19 = sld [smem:[#allocation29_spill]] (!%p2372_p1) }
 0x2b3   : > { %1290 = vrot.lane.b32.xlu2 %v3018_v59, %s2677_s1 }
 0x2bb   : > { %1396 = vrot.lane.b32.xlu2 %v3014_v56, %s2674_s18 }
 0x2c3   : > { %1394 = vrot.lane.b32.xlu2 %v3014_v56, %s2676_s2  ;;  %s3345_s2 = scalar_lea.vmem %s3276_s10, %s2873_s22 }
 0x2cb   : > { %1546 = vrot.lane.b32.xlu2 %v3018_v59, %s2675_s16  ;;  %s3349_s16 = sld [smem:[#allocation28_spill]] (!%p2372_p1) }
 0x2f4   : > { %v1146_v60 = vpop.permute.xlu2 %1145 }
 0x2f5   : > { %v1152_v61 = vsel %vm1147_vm2, %v1146_v60, 0 }
 0x2f6   : > { %1161 = vmatpush.bf16.xpose.msra.mxu1 %v1152_v61 }
 0x2fd   : > { %v1171_v62 = vpop.permute.xlu2 %1170  ;;  %2317 = vmatmul.msk.bf16.vlgmr.msra.gmra.mxu1 %vm1147_vm2, %v1137_v54 }
 0x2fe   : > { %v1176_v63 = vsel %vm1147_vm2, %v1171_v62, 0 }
 0x2ff   : > { %1185 = vmatpush.bf16.xpose.msra.mxu2 %v1176_v63 }
 0x305   : > { %v1268_v0 = vpop.permute.xlu2 %1267 }
 0x306   : > { %2318 = vmatmul.msk.bf16.vlgmr.msra.gmra.mxu2 %vm1147_vm2, %v1138_v57 }
 0x30c   : > { %v1270_v1 = vpop.permute.xlu0 %1269 }
 0x30d   : > { %v1291_v2 = vpop.permute.xlu2 %1290  ;;  %v1275_v3 = vsel %vm1147_vm2, %v1270_v1, 0 }
 0x30e   : > { %1284 = vmatpush.bf16.xpose.msrb.mxu0 %v1275_v3 }
 0x314   : > { %v1420_v4 = vpop.permute.xlu0 %1419  ;;  %v1293_v5 = vpop.permute.xlu1 %1292 }
 0x315   : > { %v1425_v6 = vsel %vm1147_vm2, %v1420_v4, 0  ;;  %v1397_v7 = vpop.permute.xlu2 %1396  ;;  %2321 = vmatmul.msk.bf16.vlgmr.msrb.gmra.mxu0 %vm1147_vm2, %v1268_v0  ;;  %v1298_v8 = vsel %vm1147_vm2, %v1293_v5, 0 }
 0x316   : > { %v1402_v9 = vsel %vm1147_vm2, %v1397_v7, 0  ;;  %1307 = vmatpush.bf16.xpose.msrb.mxu1 %v1298_v8 }
 0x317   : > { %1411 = vmatpush.bf16.xpose.msra.mxu0 %v1402_v9 }
 0x31c   : > { %v1524_v10 = vpop.permute.xlu0 %1523  ;;  %v1418_v15 = vpop.permute.xlu1 %1417 }
 0x31d   : > { %v1529_v11 = vsel %vm1147_vm2, %v1524_v10, 0  ;;  %v1395_v12 = vpop.permute.xlu2 %1394  ;;  %2322 = vmatmul.msk.bf16.vlgmr.msrb.gmra.mxu1 %vm1147_vm2, %v1291_v2 }
 0x31e   : > { %1434 = vmatpush.bf16.xpose.msra.mxu1 %v1425_v6 }
 0x31f   : > { %1538 = vmatpush.bf16.xpose.msrb.mxu0 %v1529_v11 }
 0x324   : > { %v1522_v16 = vpop.permute.xlu1 %1521  ;;  %v1545_v17 = vpop.permute.xlu0 %1544 }
 0x325   : > { %v1547_v13 = vpop.permute.xlu2 %1546  ;;  %2325 = vmatmul.msk.bf16.vlgmr.msra.gmra.mxu0 %vm1147_vm2, %v1395_v12 }
 0x326   : > { %v1552_v14 = vsel %vm1147_vm2, %v1547_v13, 0 }
 0x327   : > { %1561 = vmatpush.bf16.xpose.msrb.mxu1 %v1552_v14 }
 0x32d   : > { %2326 = vmatmul.msk.bf16.vlgmr.msra.gmra.mxu1 %vm1147_vm2, %v1418_v15 }
 0x335   : > { %2329 = vmatmul.msk.bf16.vlgmr.msrb.gmra.mxu0 %vm1147_vm2, %v1522_v16 }
 0x33d   : > { %2330 = vmatmul.msk.bf16.vlgmr.msrb.gmra.mxu1 %vm1147_vm2, %v1545_v17 }
 0x37a   : > { %v1163_v20 = vpop.f32.mrf.mxu1 }
 0x37b   : > { %v1193_v21 = vsel %vm1141_vm3, %v1163_v20, -1e+30 }
 0x37c   : > { %v1195_v22 = vsel %vm1147_vm2, %v1193_v21, -inf }
 0x37d   : > { %1196 = vmax.xlane.f32.xlu2 %v1195_v22 }
 0x382   : > { %v1165_v23 = vpop.f32.mrf.mxu1 }
 0x389   : > { %v1187_v24 = vpop.f32.mrf.mxu2 }
 0x38a   : > { %v1194_v25 = vsel %vm1141_vm3, %v1187_v24, -1e+30 }
 0x38b   : > { %v1198_v26 = vsel %vm1147_vm2, %v1194_v25, -inf }
 0x38c   : > { %1199 = vmax.xlane.f32.xlu1 %v1198_v26 }
 0x391   : > { %v1189_v27 = vpop.f32.mrf.mxu2 }
 0x392   : > { %v1286_v28 = vpop.f32.mrf.mxu0 }
 0x393   : > { %v1313_v29 = vsel %vm1141_vm3, %v1286_v28, -1e+30 }
 0x394   : > { %v1315_v30 = vsel %vm1147_vm2, %v1313_v29, -inf }
 0x395   : > { %1241 = vrot.lane.b32.xlu2 %v3018_v59, %s2679_s29  ;;  %1316 = vmax.xlane.f32.xlu0 %v1315_v30 }
 0x39a   : > { %v1288_v32 = vpop.f32.mrf.mxu0  ;;  %v1309_v34 = vpop.f32.mrf.mxu1 }
 0x39b   : > { %v1314_v44 = vsel %vm1141_vm3, %v1309_v34, -1e+30 }
 0x39c   : > { %v1318_v46 = vsel %vm1147_vm2, %v1314_v44, -inf }
 0x39d   : > { %1360 = vrot.lane.b32.xlu2 %v3018_v59, %s2680_s24 }
 0x3a2   : > { %v1311_v35 = vpop.f32.mrf.mxu1  ;;  %v1413_v36 = vpop.f32.mrf.mxu0 }
 0x3a3   : > { %v1440_v48 = vsel %vm1141_vm3, %v1413_v36, -1e+30 }
 0x3a4   : > { %v1442_v51 = vsel %vm1147_vm2, %v1440_v48, -inf }
 0x3a5   : > { %1219 = vrot.lane.b32.xlu1 %v3014_v56, %s2679_s29 }
 0x3a9   : > { %1339 = vrot.lane.b32.xlu0 %v3014_v56, %s2680_s24 }
 0x3aa   : > { %v1415_v37 = vpop.f32.mrf.mxu0  ;;  %v1436_v38 = vpop.f32.mrf.mxu1 }
 0x3ab   : > { %v1441_v52 = vsel %vm1141_vm3, %v1436_v38, -1e+30 }
 0x3ac   : > { %v1445_v53 = vsel %vm1147_vm2, %v1441_v52, -inf }
 0x3b2   : > { %v1438_v39 = vpop.f32.mrf.mxu1  ;;  %v1540_v40 = vpop.f32.mrf.mxu0 }
 0x3b3   : > { %v1567_v54 = vsel %vm1141_vm3, %v1540_v40, -1e+30 }
 0x3b4   : > { %v1569_v55 = vsel %vm1147_vm2, %v1567_v54, -inf }
 0x3ba   : > { %v1542_v42 = vpop.f32.mrf.mxu0  ;;  %v1563_v43 = vpop.f32.mrf.mxu1 }
 0x3bb   : > { %v3061_v47 = vsel %vm1141_vm3, %v1563_v43, -1e+30 }
 0x3bc   : > { %v1572_v50 = vsel %vm1147_vm2, %v3061_v47, -inf }
 0x3c2   : > { %v1565_v45 = vpop.f32.mrf.mxu1 }
 0x3c6   : > { %1319 = vmax.xlane.f32.xlu2 %v1318_v46 }
 0x3ce   : > { %1573 = vmax.xlane.f32.xlu2 %v1572_v50 }
 0x3cf   : > { %1443 = vmax.xlane.f32.xlu1 %v1442_v51 }
 0x3d3   : > { %1446 = vmax.xlane.f32.xlu0 %v1445_v53 }
 0x3db   : > { %1570 = vmax.xlane.f32.xlu0 %v1569_v55 }
 0x3f0   : > { %v1197_v49 = vpop.xlane.xlu2 %1196 }
 0x3f1   : > { %v1201_v57 = vsub.f32 %v1193_v21, %v1197_v49 }
 0x3f3   : > { %v1203_v58 = vmul.f32 1.442695, %v1201_v57 }
 0x3f5   : > { %2521 = vpow2.f32 %v1203_v58 }
 0x3f8   : > { %v1242_v6 = vpop.permute.xlu2 %1241 }
 0x3f9   : > { %v1247_v10 = vsel %vm1224_vm5, %v1242_v6, 0 }
 0x3fb   : > { %v3071_v60 = vpop.eup %2521 }
 0x3fc   : > { %v1207_v61 = vsel %vm1147_vm2, %v3071_v60, 0.0 }
 0x3fd   : > { %1208 = vadd.xlane.f32.xlu2 %v1207_v61 }
 0x3ff   : > { %v1200_v62 = vpop.xlane.xlu1 %1199 }
 0x400   : > { %v1202_v1 = vsub.f32 %v1194_v25, %v1200_v62  ;;  %v1361_v14 = vpop.permute.xlu2 %1360 }
 0x401   : > { %v1366_v45 = vsel %vm1224_vm5, %v1361_v14, 0 }
 0x402   : > { %v1205_v3 = vmul.f32 1.442695, %v1202_v1 }
 0x408   : > { %v1317_v63 = vpop.xlane.xlu0 %1316 }
 0x409   : > { %v1321_v0 = vsub.f32 %v1313_v29, %v1317_v63 }
 0x40b   : > { %v1323_v2 = vmul.f32 1.442695, %v1321_v0 }
 0x40d   : > { %2523 = vpow2.f32 %v1323_v2 }
 0x40e   : > { %2525 = vpow2.f32 %v1205_v3 }
 0x413   : > { %v3075_v4 = vpop.eup %2523 }
 0x414   : > { %v1327_v5 = vsel %vm1147_vm2, %v3075_v4, 0.0  ;;  %v3082_v9 = vpop.eup %2525 }
 0x415   : > { %1328 = vadd.xlane.f32.xlu0 %v1327_v5  ;;  %1487 = vrot.lane.b32.xlu2 %v3018_v59, %s2681_s20  ;;  %v1210_v13 = vsel %vm1147_vm2, %v3082_v9, 0.0 }
 0x417   : > { %v1220_v7 = vpop.permute.xlu1 %1219 }
 0x418   : > { %v1226_v8 = vsel %vm1224_vm5, %v1220_v7, 0 }
 0x419   : > { %1235 = vmatpush.bf16.msra.mxu3 %v1226_v8 }
 0x41b   : > { %v1340_v11 = vpop.permute.xlu0 %1339 }
 0x41c   : > { %v1345_v12 = vsel %vm1224_vm5, %v1340_v11, 0 }
 0x41d   : > { %1256 = vmatpush.bf16.msrb.mxu3 %v1247_v10  ;;  %1354 = vmatpush.bf16.msrb.mxu2 %v1345_v12 }
 0x41e   : > { %1211 = vadd.xlane.f32.xlu0 %v1210_v13 }
 0x439   : > { %v1320_v15 = vpop.xlane.xlu2 %1319 }
 0x43a   : > { %v1322_v16 = vsub.f32 %v1314_v44, %v1320_v15 }
 0x43c   : > { %v1325_v17 = vmul.f32 1.442695, %v1322_v16 }
 0x43e   : > { %2527 = vpow2.f32 %v1325_v17 }
 0x441   : > { %v1574_v37 = vpop.xlane.xlu2 %1573 }
 0x442   : > { %v1444_v18 = vpop.xlane.xlu1 %1443  ;;  %v1576_v40 = vsub.f32 %v3061_v47, %v1574_v37 }
 0x443   : > { %v1448_v19 = vsub.f32 %v1440_v48, %v1444_v18 }
 0x444   : > { %v2528_v20 = vpop.eup %2527  ;;  %v1579_v44 = vmul.f32 1.442695, %v1576_v40 }
 0x445   : > { %v1450_v21 = vmul.f32 1.442695, %v1448_v19  ;;  %v1330_v22 = vsel %vm1147_vm2, %v2528_v20, 0.0 }
 0x446   : > { %v1447_v23 = vpop.xlane.xlu0 %1446  ;;  %1331 = vadd.xlane.f32.xlu1 %v1330_v22 }
 0x447   : > { %2529 = vpow2.f32 %v1450_v21  ;;  %v1449_v24 = vsub.f32 %v1441_v52, %v1447_v23 }
 0x449   : > { %v1452_v25 = vmul.f32 1.442695, %v1449_v24 }
 0x44b   : > { %2531 = vpow2.f32 %v1452_v25 }
 0x44d   : > { %v3089_v26 = vpop.eup %2529 }
 0x44e   : > { %v1571_v27 = vpop.xlane.xlu0 %1570  ;;  %v1454_v28 = vsel %vm1147_vm2, %v3089_v26, 0.0 }
 0x44f   : > { %v1575_v29 = vsub.f32 %v1567_v54, %v1571_v27  ;;  %1455 = vadd.xlane.f32.xlu2 %v1454_v28 }
 0x451   : > { %v2532_v30 = vpop.eup %2531  ;;  %v1577_v32 = vmul.f32 1.442695, %v1575_v29 }
 0x452   : > { %v1457_v34 = vsel %vm1147_vm2, %v2532_v30, 0.0 }
 0x453   : > { %2533 = vpow2.f32 %v1577_v32  ;;  %1458 = vadd.xlane.f32.xlu0 %v1457_v34 }
 0x459   : > { %v3094_v35 = vpop.eup %2533 }
 0x45a   : > { %v1581_v36 = vsel %vm1147_vm2, %v3094_v35, 0.0 }
 0x45b   : > { %1582 = vadd.xlane.f32.xlu0 %v1581_v36 }
 0x45f   : > { %1466 = vrot.lane.b32.xlu1 %v3014_v56, %s2681_s20  ;;  %s3347_s20 = sld [smem:[#allocation27_spill]] (!%p2372_p1) }
 0x467   : > { %1614 = vrot.lane.b32.xlu2 %v3018_v59, %s2682_s30 }
 0x46f   : > { %1593 = vrot.lane.b32.xlu0 %v3014_v56, %s2682_s30 }
 0x470   : > { %v1209_v38 = vpop.xlane.xlu2 %1208 }
 0x471   : > { %2535 = vrcp.f32 %v1209_v38 }
 0x472   : > { %2537 = vpow2.f32 %v1579_v44 }
 0x477   : > { %v2536_v39 = vpop.eup %2535 }
 0x478   : > { %v1215_v42 = vmul.f32 %v2536_v39, %v3071_v60  ;;  %v2538_v46 = vpop.eup %2537  ;;  %v1488_v54 = vpop.permute.xlu2 %1487 }
 0x479   : > { %v1584_v48 = vsel %vm1147_vm2, %v2538_v46, 0.0  ;;  %v1493_v49 = vsel %vm1224_vm5, %v1488_v54, 0 }
 0x47a   : > { %v1217_v43 = vpack.c.bf16 %v1215_v42, %v1215_v42 }
 0x47c   : > { %2319 = vmatmul.msk.bf16.vlgmr.msra.gmra.mxu3 %vm1147_vm2, %v1217_v43 }
 0x47d   : > { %1375 = vmatpush.bf16.msra.mxu3 %v1366_v45 }
 0x488   : > { %v1329_v59 = vpop.xlane.xlu0 %1328 }
 0x489   : > { %2539 = vrcp.f32 %v1329_v59  ;;  %1585 = vadd.xlane.f32.xlu1 %v1584_v48 }
 0x48f   : > { %v2540_v56 = vpop.eup %2539 }
 0x490   : > { %v1335_v50 = vmul.f32 %v2540_v56, %v3075_v4 }
 0x491   : > { %v1212_v47 = vpop.xlane.xlu0 %1211 }
 0x492   : > { %2541 = vrcp.f32 %v1212_v47  ;;  %v1337_v51 = vpack.c.bf16 %v1335_v50, %v1335_v50  ;;  %v2407_v50 = vld [vmem:[%s2895_s15 + $0x8] sm:$0xff] }
 0x493   : > { %1680 = vmatpush.bf16.msra.mxu0 %v2407_v50 }
 0x494   : > { %2323 = vmatmul.msk.bf16.vlgmr.msrb.gmra.mxu2 %vm1147_vm2, %v1337_v51 }
 0x498   : > { %v2542_v52 = vpop.eup %2541 }
 0x499   : > { %v1216_v53 = vmul.f32 %v2542_v52, %v3082_v9  ;;  %v2406_v52 = vld [vmem:[%s2895_s15] sm:$0xff] }
 0x49a   : > { %1681 = vmatpush.bf16.msra.mxu0 %v2406_v52 }
 0x49b   : > { %v1218_v55 = vpack.c.bf16 %v1216_v53, %v1216_v53 }
 0x49d   : > { %2320 = vmatmul.msk.bf16.vlgmr.msrb.gmra.mxu3 %vm1147_vm2, %v1218_v55 }
 0x49e   : > { %1502 = vmatpush.bf16.msrb.mxu3 %v1493_v49 }
 0x4b9   : > { %v1332_v57 = vpop.xlane.xlu1 %1331 }
 0x4ba   : > { %2543 = vrcp.f32 %v1332_v57 }
 0x4c0   : > { %v2544_v58 = vpop.eup %2543 }
 0x4c1   : > { %v1336_v60 = vmul.f32 %v2544_v58, %v2528_v20 }
 0x4c2   : > { %v1456_v61 = vpop.xlane.xlu2 %1455 }
 0x4c3   : > { %v1338_v62 = vpack.c.bf16 %v1336_v60, %v1336_v60  ;;  %2545 = vrcp.f32 %v1456_v61 }
 0x4c5   : > { %2324 = vmatmul.msk.bf16.vlgmr.msra.gmra.mxu3 %vm1147_vm2, %v1338_v62 }
 0x4c6   : > { %v1459_v63 = vpop.xlane.xlu0 %1458 }
 0x4c7   : > { %2547 = vrcp.f32 %v1459_v63 }
 0x4c9   : > { %v2546_v2 = vpop.eup %2545 }
 0x4ca   : > { %v1615_v0 = vpop.permute.xlu2 %1614  ;;  %v1462_v5 = vmul.f32 %v2546_v2, %v3089_v26 }
 0x4cb   : > { %v1620_v1 = vsel %vm1224_vm5, %v1615_v0, 0 }
 0x4cc   : > { %1629 = vmatpush.bf16.msra.mxu3 %v1620_v1  ;;  %v1464_v9 = vpack.c.bf16 %v1462_v5, %v1462_v5 }
 0x4cd   : > { %v2548_v3 = vpop.eup %2547 }
 0x4ce   : > { %v1463_v4 = vmul.f32 %v2548_v3, %v2532_v30  ;;  %v1583_v10 = vpop.xlane.xlu0 %1582 }
 0x4cf   : > { %2549 = vrcp.f32 %v1583_v10 }
 0x4d0   : > { %v1465_v8 = vpack.c.bf16 %v1463_v4, %v1463_v4 }
 0x4d1   : > { %v1467_v6 = vpop.permute.xlu1 %1466 }
 0x4d2   : > { %v1472_v7 = vsel %vm1224_vm5, %v1467_v6, 0 }
 0x4d3   : > { %1481 = vmatpush.bf16.msra.mxu2 %v1472_v7 }
 0x4d5   : > { %2328 = vmatmul.msk.bf16.vlgmr.msrb.gmra.mxu3 %vm1147_vm2, %v1465_v8  ;;  %v2550_v11 = vpop.eup %2549  ;;  %v2409_v8 = vld [vmem:[%s2908_s4 + $0x8] sm:$0xff] }
 0x4d6   : > { %2327 = vmatmul.msk.bf16.vlgmr.msra.gmra.mxu2 %vm1147_vm2, %v1464_v9  ;;  %v1589_v12 = vmul.f32 %v2550_v11, %v3094_v35  ;;  %1814 = vmatpush.bf16.msra.mxu1 %v2409_v8  ;;  %v2408_v9 = vld [vmem:[%s2908_s4] sm:$0xff]  ;;  %v2412_v8 = vld [vmem:[%s2922_s26 + $0x10] sm:$0xff] }
 0x4d8   : > { %v1591_v15 = vpack.c.bf16 %v1589_v12, %v1589_v12 }
 0x4da   : > { %1815 = vmatpush.bf16.msra.mxu1 %v2408_v9  ;;  %v2411_v9 = vld [vmem:[%s2922_s26 + $0x8] sm:$0xff] }
 0x4e1   : > { %v1594_v13 = vpop.permute.xlu0 %1593 }
 0x4e2   : > { %v1599_v14 = vsel %vm1224_vm5, %v1594_v13, 0 }
 0x4e3   : > { %1608 = vmatpush.bf16.msrb.mxu2 %v1599_v14 }
 0x4e6   : > { %2331 = vmatmul.msk.bf16.vlgmr.msrb.gmra.mxu2 %vm1147_vm2, %v1591_v15 }
 0x4fc   : > { %v1586_v16 = vpop.xlane.xlu1 %1585 }
 0x4fd   : > { %2551 = vrcp.f32 %v1586_v16 }
 0x4ff   : > { %v1237_v17 = vpop.f32.mrf.mxu3 }
 0x500   : > { %v1262_v18 = vpack.c.bf16 %v1237_v17, %v1237_v17 }
 0x502   : > { %1265 = vst.msk [vmem:[#allocation3] sm:$0xf] %vm1264_vm6, %v1262_v18 }
 0x503   : > { %v2552_v19 = vpop.eup %2551 }
 0x504   : > { %v1590_v20 = vmul.f32 %v2552_v19, %v2538_v46 }
 0x506   : > { %v1592_v21 = vpack.c.bf16 %v1590_v20, %v1590_v20 }
 0x507   : > { %v1239_v22 = vpop.f32.mrf.mxu3 }
 0x508   : > { %2332 = vmatmul.msk.bf16.vlgmr.msra.gmra.mxu3 %vm1147_vm2, %v1592_v21 }
 0x517   : > { %v1356_v23 = vpop.f32.mrf.mxu2 }
 0x518   : > { %v1381_v24 = vpack.c.bf16 %v1356_v23, %v1356_v23 }
 0x51a   : > { %1385 = vrot.lane.b32.xlu0 %v1381_v24, %s2683_s25 }
 0x51f   : > { %v1358_v26 = vpop.f32.mrf.mxu2 }
 0x520   : > { %v1258_v25 = vpop.f32.mrf.mxu3 }
 0x521   : > { %v1263_v27 = vpack.c.bf16 %v1258_v25, %v1258_v25 }
 0x523   : > { %1266 = vst.msk [vmem:[#allocation3 + $0x4] sm:$0xf] %vm1264_vm6, %v1263_v27 }
 0x528   : > { %v1260_v28 = vpop.f32.mrf.mxu3 }
 0x548   : > { %v1377_v29 = vpop.f32.mrf.mxu3 }
 0x549   : > { %v1382_v30 = vpack.c.bf16 %v1377_v29, %v1377_v29 }
 0x54b   : > { %1387 = vrot.lane.b32.xlu2 %v1382_v30, %s2683_s25 }
 0x550   : > { %v1379_v32 = vpop.f32.mrf.mxu3 }
 0x558   : > { %v1504_v34 = vpop.f32.mrf.mxu3 }
 0x559   : > { %v1509_v35 = vpack.c.bf16 %v1504_v34, %v1504_v34  ;;  %v1483_v36 = vpop.f32.mrf.mxu2 }
 0x55a   : > { %v1508_v37 = vpack.c.bf16 %v1483_v36, %v1483_v36 }
 0x55b   : > { %1514 = vrot.lane.b32.xlu2 %v1509_v35, %s2684_s3  ;;  %v2413_v35 = vld [vmem:[%s2922_s26 + $0x18] sm:$0xff] }
 0x55c   : > { %1512 = vrot.lane.b32.xlu0 %v1508_v37, %s2684_s3  ;;  %1869 = vmatpush.bf16.msra.mxu2 %v2413_v35 }
 0x560   : > { %v1506_v38 = vpop.f32.mrf.mxu3  ;;  %1870 = vmatpush.bf16.msra.mxu2 %v2412_v8 }
 0x561   : > { %v1485_v39 = vpop.f32.mrf.mxu2 }
 0x564   : > { %1871 = vmatpush.bf16.msra.mxu2 %v2411_v9 }
 0x569   : > { %v1610_v40 = vpop.f32.mrf.mxu2 }
 0x56a   : > { %v1635_v42 = vpack.c.bf16 %v1610_v40, %v1610_v40 }
 0x56c   : > { %1639 = vrot.lane.b32.xlu0 %v1635_v42, %s2685_s5 }
 0x571   : > { %v1612_v43 = vpop.f32.mrf.mxu2 }
 0x58b   : > { %v1631_v44 = vpop.f32.mrf.mxu3 }
 0x58c   : > { %v1636_v45 = vpack.c.bf16 %v1631_v44, %v1631_v44  ;;  %v1386_v46 = vpop.permute.xlu0 %1385 }
 0x58d   : > { %1392 = vst.msk [vmem:[#allocation3] sm:$0xf] %vm1391_vm7, %v1386_v46 }
 0x58e   : > { %1641 = vrot.lane.b32.xlu1 %v1636_v45, %s2685_s5  ;;  %s3348_s5 = sld [smem:[#allocation30_spill]] (!%p2372_p1) }
 0x593   : > { %v1633_v59 = vpop.f32.mrf.mxu3 }
 0x5a5   : > { %v1388_v48 = vpop.permute.xlu2 %1387 }
 0x5a6   : > { %1393 = vst.msk [vmem:[#allocation3 + $0x4] sm:$0xf] %vm1391_vm7, %v1388_v48  ;;  %vm1861_vm7 = vcmask 523264  }
 0x5b5   : > { %v1515_v56 = vpop.permute.xlu2 %1514 }
 0x5b6   : > { %1520 = vst.msk [vmem:[#allocation3 + $0x4] sm:$0xf] %vm1518_vm8, %v1515_v56 }
 0x5ce   : > { %v1513_v47 = vpop.permute.xlu0 %1512 }
 0x5cf   : > { %1519 = vst.msk [vmem:[#allocation3] sm:$0xf] %vm1518_vm8, %v1513_v47 }
 0x5de   : > { %v1640_v51 = vpop.permute.xlu0 %1639 }
 0x5df   : > { %1646 = vst.msk [vmem:[#allocation3] sm:$0xf] %vm1645_vm9, %v1640_v51  ;;  %v2507_v51 = vld [vmem:[%s3344_s23] ss:$0 sm:$0xff] }
 0x600   : > { %v1642_v53 = vpop.permute.xlu1 %1641 }
 0x601   : > { %1647 = vst.msk [vmem:[#allocation3 + $0x4] sm:$0xf] %vm1645_vm9, %v1642_v53 }
 0x608   : > { %v2405_v54 = vld [vmem:[#allocation3] sm:$0xff] }
 0x609   : > { %2345 = vmatmul.msk.bf16.vlgmr.msra.gmra.mxu0 %vm1003_vm4, %v2405_v54 }
 0x686   : > { %v1683_v55 = vpop.f32.mrf.mxu0 }
 0x687   : > { %v3128_v49 = vadd.f32 %v1683_v55, %v2975_v31 }
 0x689   : > { %v1692_v57 = vsel %vm1003_vm4, %v3128_v49, 0.0 }
 0x68a   : > { %1693 = vadd.xlane.f32.xlu2 %v1692_v57 }
 0x68e   : > { %v1685_v58 = vpop.f32.mrf.mxu0 }
 0x68f   : > { %v3133_v60 = vadd.f32 %v1685_v58, %v2979_v33  ;;  %v2508_v58 = vld [vmem:[%s3345_s2] ss:$0 sm:$0xff] }
 0x691   : > { %v1695_v61 = vsel %vm1003_vm4, %v3133_v60, 0.0 }
 0x692   : > { %1696 = vadd.xlane.f32.xlu0 %v1695_v61 }
 0x6fd   : > { %v1694_v62 = vpop.xlane.xlu2 %1693 }
 0x6fe   : > { %v1698_v63 = vmul.f32 %v1694_v62, %v2983_v41 }
 0x700   : > { %v3139_v31 = vsub.f32 %v3128_v49, %v1698_v63 }
 0x702   : > { %v1702_v0 = vmul.f32 %v3139_v31, %v3139_v31 }
 0x704   : > { %v1704_v1 = vsel %vm1003_vm4, %v1702_v0, 0.0 }
 0x705   : > { %1705 = vadd.xlane.f32.xlu1 %v1704_v1  ;;  %v1697_v33 = vpop.xlane.xlu0 %1696 }
 0x706   : > { %v1699_v2 = vmul.f32 %v1697_v33, %v2983_v41 }
 0x708   : > { %v3146_v3 = vsub.f32 %v3133_v60, %v1699_v2 }
 0x70a   : > { %v1703_v4 = vmul.f32 %v3146_v3, %v3146_v3 }
 0x70c   : > { %v1707_v5 = vsel %vm1003_vm4, %v1703_v4, 0.0 }
 0x70d   : > { %1708 = vadd.xlane.f32.xlu2 %v1707_v5 }
 0x778   : > { %v1706_v6 = vpop.xlane.xlu1 %1705 }
 0x779   : > { %v1710_v7 = vmul.f32 0.032258064, %v1706_v6 }
 0x77b   : > { %2553 = vrsqrt.f32 %v1710_v7  ;;  %vm1719_vm10 = vcmp.eq.f32.partialorder %v1710_v7, inf  ;;  %v1722_v22 = vand.u32 2147483648, %v1710_v7  ;;  %vm1721_vm11 = vcmp.eq.f32.partialorder %v1710_v7, 0.0 }
 0x780   : > { %v1709_v10 = vpop.xlane.xlu2 %1708 }
 0x781   : > { %v2554_v11 = vpop.eup %2553  ;;  %v1711_v12 = vmul.f32 0.032258064, %v1709_v10  ;;  %v2410_v10 = vld [vmem:[%s2922_s26] sm:$0xff] }
 0x782   : > { %v1713_v13 = vmul.f32 %v2554_v11, %v1710_v7  ;;  %1872 = vmatpush.bf16.msra.mxu2 %v2410_v10 }
 0x783   : > { %2555 = vrsqrt.f32 %v1711_v12  ;;  %vm1731_vm12 = vcmp.eq.f32.partialorder %v1711_v12, inf  ;;  %v1734_v30 = vand.u32 2147483648, %v1711_v12  ;;  %vm1733_vm13 = vcmp.eq.f32.partialorder %v1711_v12, 0.0 }
 0x784   : > { %v1714_v14 = vmul.f32 %v2554_v11, %v1713_v13 }
 0x786   : > { %v1715_v15 = vmul.f32 0.5, %v1714_v14 }
 0x788   : > { %v1716_v16 = vsub.f32 1.5, %v1715_v15 }
 0x789   : > { %v2556_v17 = vpop.eup %2555 }
 0x78a   : > { %v1717_v18 = vmul.f32 %v2554_v11, %v1716_v16  ;;  %v1725_v19 = vmul.f32 %v2556_v17, %v1711_v12 }
 0x78c   : > { %v1718_v20 = vmul.f32 %v1717_v18, %v1710_v7  ;;  %v1726_v21 = vmul.f32 %v2556_v17, %v1725_v19  ;;  %v2510_v18 = vld [vmem:[%s835_s7] ss:$0 sm:$0xff]  ;;  %s3351_s7 = sld [smem:[#allocation31_spill]] (!%p2372_p1) }
 0x78e   : > { %v1720_v23 = vsel %vm1719_vm10, %v1710_v7, %v1718_v20  ;;  %v1727_v24 = vmul.f32 0.5, %v1726_v21 }
 0x78f   : > { %v1723_v25 = vsel %vm1721_vm11, %v1722_v22, %v1720_v23 }
 0x790   : > { %v1736_v26 = vadd.f32 1e-06, %v1723_v25  ;;  %v1728_v27 = vsub.f32 1.5, %v1727_v24 }
 0x792   : > { %2557 = vrcp.f32 %v1736_v26  ;;  %v1729_v28 = vmul.f32 %v2556_v17, %v1728_v27  ;;  %v1749_v40 = vand.u32 2147483648, %v1736_v26  ;;  %v1747_v43 = vand.u32 2147483647, %v1736_v26 }
 0x793   : > { %vm1743_vm15 = vweird.f32 %v1736_v26 }
 0x794   : > { %v1730_v29 = vmul.f32 %v1729_v28, %v1711_v12  ;;  %v1750_v46 = vor.u32 1.1754944e-38, %v1749_v40  ;;  %vm1748_vm1 = vcmp.eq.f32.partialorder %v1747_v43, 8.507059e+37 }
 0x796   : > { %v1732_v32 = vsel %vm1731_vm12, %v1711_v12, %v1730_v29 }
 0x797   : > { %v1735_v34 = vsel %vm1733_vm13, %v1734_v30, %v1732_v32 }
 0x798   : > { %v2558_v36 = vpop.eup %2557  ;;  %v1737_v37 = vadd.f32 1e-06, %v1735_v34 }
 0x799   : > { %v1739_v38 = vmul.f32 %v2558_v36, %v1736_v26  ;;  %vm1744_vm14 = vweird.f32 %v2558_v36 }
 0x79a   : > { %2559 = vrcp.f32 %v1737_v37  ;;  %vm1745_vm0 = vmor %vm1743_vm15, %vm1744_vm14  ;;  %v1764_v52 = vand.u32 2147483648, %v1737_v37  ;;  %v1762_v54 = vand.u32 2147483647, %v1737_v37  ;;  %vm1758_vm3 = vweird.f32 %v1737_v37 }
 0x79b   : > { %v1740_v39 = vsub.f32 1.0, %v1739_v38 }
 0x79c   : > { %v1765_v61 = vor.u32 1.1754944e-38, %v1764_v52  ;;  %vm1763_vm6 = vcmp.eq.f32.partialorder %v1762_v54, 8.507059e+37 }
 0x79d   : > { %v1741_v42 = vmul.f32 %v2558_v36, %v1740_v39 }
 0x79f   : > { %v1742_v44 = vadd.f32 %v2558_v36, %v1741_v42 }
 0x7a0   : > { %v2560_v45 = vpop.eup %2559 }
 0x7a1   : > { %v1746_v59 = vsel %vm1745_vm0, %v2558_v36, %v1742_v44  ;;  %v1754_v48 = vmul.f32 %v2560_v45, %v1737_v37  ;;  %vm1759_vm2 = vweird.f32 %v2560_v45 }
 0x7a2   : > { %v1751_v56 = vsel %vm1748_vm1, %v1750_v46, %v1746_v59  ;;  %vm1760_vm5 = vmor %vm1758_vm3, %vm1759_vm2 }
 0x7a3   : > { %v1752_v50 = vmul.f32 %v1751_v56, %v3139_v31  ;;  %v1755_v47 = vsub.f32 1.0, %v1754_v48 }
 0x7a5   : > { %v1756_v53 = vmul.f32 %v2560_v45, %v1755_v47  ;;  %v1771_v57 = vmul.f32 %v2507_v51, %v1752_v50 }
 0x7a7   : > { %v1757_v55 = vadd.f32 %v2560_v45, %v1756_v53  ;;  %v1776_v0 = vadd.f32 %v2508_v58, %v1771_v57 }
 0x7a9   : > { %v1761_v62 = vsel %vm1760_vm5, %v2560_v45, %v1757_v55  ;;  %v1778_v2 = vpack.c.bf16 %v1776_v0, %v1776_v0 }
 0x7aa   : > { %v1766_v63 = vsel %vm1763_vm6, %v1765_v61, %v1761_v62 }
 0x7ab   : > { %v1767_v31 = vmul.f32 %v1766_v63, %v3146_v3  ;;  %v1790_v5 = vunpack.c.l.b16 %v1778_v2  ;;  %v2509_v3 = vld [vmem:[%s827_s28] ss:$0 sm:$0xff]  ;;  %s3346_s28 = sld [smem:[#allocation26_spill]] (!%p2372_p1) }
 0x7ad   : > { %v1772_v1 = vmul.f32 %v2507_v51, %v1767_v31 }
 0x7af   : > { %v1777_v33 = vadd.f32 %v2508_v58, %v1772_v1 }
 0x7b1   : > { %v1779_v4 = vpack.c.bf16 %v1777_v33, %v1777_v33 }
 0x7b3   : > { %v1791_v6 = vunpack.c.l.b16 %v1779_v4 }
 0x7b5   : > { %v1792_v7 = vpack.c.b16 %v1791_v6, %v1790_v5 }
 0x7b7   : > { %2354 = vmatmul.msk.bf16.vlgmr.msra.gmra.mxu1 %vm1003_vm4, %v1792_v7 }
 0x834   : > { %v1817_v11 = vpop.f32.mrf.mxu1 }
 0x835   : > { %v1818_v12 = vadd.f32 %v2509_v3, %v1817_v11 }
 0x837   : > { %v1822_v15 = vmax.f32 %v1818_v12, 0.0 }
 0x83c   : > { %v1819_v13 = vpop.f32.mrf.mxu1 }
 0x83d   : > { %v1820_v14 = vadd.f32 %v2509_v3, %v1819_v13 }
 0x83f   : > { %v1823_v16 = vmax.f32 %v1820_v14, 0.0 }
 0x841   : > { %v1824_v17 = vpack.c.bf16 %v1823_v16, %v1822_v15 }
 0x843   : > { %2371 = vmatmul.msk.bf16.vlgmr.msra.gmra.mxu2 %vm1861_vm7, %v1824_v17 }
 0x8c6   : > { %v1874_v19 = vpop.f32.mrf.mxu2 }
 0x8c7   : > { %v1875_v20 = vadd.f32 %v2510_v18, %v1874_v19 }
 0x8c9   : > { %v1879_v21 = vadd.f32 %v1875_v20, %v3128_v49 }
 0x8cb   : > { %1881 = vst.msk [vmem:[#allocation2] sm:$0xff] %vm1003_vm4, %v1879_v21 }
 0x8ce   : > { %v1876_v22 = vpop.f32.mrf.mxu2 }
 0x8cf   : > { %v1877_v23 = vadd.f32 %v2510_v18, %v1876_v22  ;;  %1886 = sbr.rel (%p2372_p1) target bundleno = 2963 (0xb93), region = 112 }
 0x8d1   : > { %v1880_v24 = vadd.f32 %v1877_v23, %v3133_v60 }
 0x8d3   : > { %1882 = vst.msk [vmem:[#allocation2 + $0x8] sm:$0xff] %vm1003_vm4, %v1880_v24 }
 0x8d4   : > { %v1891_v25 = vrot.slane %v1880_v24, 7  ;;  %vm1892_vm8 = vcmask 1041409   ;;  %vm1895_vm9 = vcmask 254976   ;;  %v2561_v11 = vld [vmem:[%s3346_s28] ss:$0 sm:$0xff]  ;;  %v2415_v23 = vld [vmem:[%s3348_s5 + $0x8] sm:$0xff] }
 0x8d5   : > { %v2562_v13 = vld [vmem:[%s3347_s20] ss:$0 sm:$0xff]  ;;  %2039 = vmatpush.bf16.msra.mxu0 %v2415_v23 }
 0x8d6   : > { %v1893_v26 = vsel %vm1892_vm8, %v1891_v25, %v1879_v21 }
 0x8d7   : > { %v1896_v27 = vsel %vm1895_vm9, %v1893_v26, 0.0 }
 0x8d8   : > { %1897 = vadd.xlane.f32.xlu0 %v1896_v27 }
 0x94b   : > { %v1898_v49 = vpop.xlane.xlu0 %1897 }
 0x94c   : > { %v1899_v28 = vmul.f32 %v1898_v49, %v2983_v41 }
 0x94e   : > { %v1901_v29 = vrot.slane %v1899_v28, 1  ;;  %v1904_v30 = vsub.f32 %v1879_v21, %v1899_v28 }
 0x950   : > { %v1905_v32 = vsub.f32 %v1880_v24, %v1901_v29  ;;  %v1906_v34 = vmul.f32 %v1904_v30, %v1904_v30  ;;  %v2414_v24 = vld [vmem:[%s3348_s5] sm:$0xff] }
 0x951   : > { %2040 = vmatpush.bf16.msra.mxu0 %v2414_v24 }
 0x952   : > { %v1907_v60 = vmul.f32 %v1905_v32, %v1905_v32 }
 0x954   : > { %v1910_v35 = vrot.slane %v1907_v60, 7 }
 0x956   : > { %v1911_v36 = vsel %vm1892_vm8, %v1910_v35, %v1906_v34 }
 0x957   : > { %v1913_v37 = vsel %vm1895_vm9, %v1911_v36, 0.0 }
 0x958   : > { %1914 = vadd.xlane.f32.xlu0 %v1913_v37 }
 0x9cb   : > { %v1915_v38 = vpop.xlane.xlu0 %1914 }
 0x9cc   : > { %v1916_v39 = vmul.f32 0.032258064, %v1915_v38 }
 0x9ce   : > { %2566 = vrsqrt.f32 %v1916_v39  ;;  %vm1924_vm10 = vcmp.eq.f32.partialorder %v1916_v39, inf  ;;  %v1927_v48 = vand.u32 2147483648, %v1916_v39  ;;  %vm1926_vm11 = vcmp.eq.f32.partialorder %v1916_v39, 0.0 }
 0x9d4   : > { %v2567_v40 = vpop.eup %2566 }
 0x9d5   : > { %v1918_v42 = vmul.f32 %v2567_v40, %v1916_v39 }
 0x9d7   : > { %v1919_v43 = vmul.f32 %v2567_v40, %v1918_v42 }
 0x9d9   : > { %v1920_v44 = vmul.f32 0.5, %v1919_v43 }
 0x9db   : > { %v1921_v45 = vsub.f32 1.5, %v1920_v44 }
 0x9dd   : > { %v1922_v46 = vmul.f32 %v2567_v40, %v1921_v45  ;;  %v2565_v40 = vld [vmem:[%s3351_s7] ss:$0 sm:$0xff] }
 0x9df   : > { %v1923_v59 = vmul.f32 %v1922_v46, %v1916_v39 }
 0x9e1   : > { %v1925_v56 = vsel %vm1924_vm10, %v1916_v39, %v1923_v59 }
 0x9e2   : > { %v1928_v50 = vsel %vm1926_vm11, %v1927_v48, %v1925_v56 }
 0x9e3   : > { %v1929_v47 = vadd.f32 1e-06, %v1928_v50 }
 0x9e5   : > { %2568 = vrcp.f32 %v1929_v47  ;;  %v1931_v51 = vrot.slane %v1929_v47, 1  ;;  %vm1939_vm13 = vweird.f32 %v1929_v47  ;;  %v1943_v62 = vand.u32 2147483647, %v1929_v47 }
 0x9e6   : > { %v1945_v63 = vand.u32 2147483648, %v1929_v47 }
 0x9e7   : > { %2570 = vrcp.f32 %v1931_v51  ;;  %v1960_v31 = vand.u32 2147483648, %v1931_v51  ;;  %v1958_v33 = vand.u32 2147483647, %v1931_v51  ;;  %vm1954_vm0 = vweird.f32 %v1931_v51 }
 0x9e8   : > { %v1946_v5 = vor.u32 1.1754944e-38, %v1945_v63  ;;  %vm1944_vm2 = vcmp.eq.f32.partialorder %v1943_v62, 8.507059e+37 }
 0x9e9   : > { %v1961_v6 = vor.u32 1.1754944e-38, %v1960_v31  ;;  %vm1959_vm3 = vcmp.eq.f32.partialorder %v1958_v33, 8.507059e+37 }
 0x9eb   : > { %v2569_v52 = vpop.eup %2568 }
 0x9ec   : > { %v1935_v53 = vmul.f32 %v2569_v52, %v1929_v47  ;;  %vm1940_vm12 = vweird.f32 %v2569_v52 }
 0x9ed   : > { %v2571_v54 = vpop.eup %2570  ;;  %vm1941_vm15 = vmor %vm1939_vm13, %vm1940_vm12 }
 0x9ee   : > { %v1936_v55 = vsub.f32 1.0, %v1935_v53  ;;  %v1950_v57 = vmul.f32 %v2571_v54, %v1931_v51  ;;  %vm1955_vm14 = vweird.f32 %v2571_v54 }
 0x9ef   : > { %vm1956_vm1 = vmor %vm1954_vm0, %vm1955_vm14 }
 0x9f0   : > { %v1937_v58 = vmul.f32 %v2569_v52, %v1936_v55  ;;  %v1951_v61 = vsub.f32 1.0, %v1950_v57 }
 0x9f2   : > { %v1938_v0 = vadd.f32 %v2569_v52, %v1937_v58  ;;  %v1952_v1 = vmul.f32 %v2571_v54, %v1951_v61 }
 0x9f4   : > { %v1942_v2 = vsel %vm1941_vm15, %v2569_v52, %v1938_v0  ;;  %v1953_v4 = vadd.f32 %v2571_v54, %v1952_v1 }
 0x9f5   : > { %v1947_v8 = vsel %vm1944_vm2, %v1946_v5, %v1942_v2 }
 0x9f6   : > { %v1957_v7 = vsel %vm1956_vm1, %v2571_v54, %v1953_v4  ;;  %v1948_v3 = vmul.f32 %v1947_v8, %v1904_v30 }
 0x9f7   : > { %v1962_v9 = vsel %vm1959_vm3, %v1961_v6, %v1957_v7 }
 0x9f8   : > { %v1963_v10 = vmul.f32 %v1962_v9, %v1905_v32  ;;  %v2563_v32 = vld [vmem:[%s3349_s16] ss:$0 sm:$0xff] }
 0x9fa   : > { %v1969_v12 = vrot.slane %v1963_v10, 7 }
 0x9fc   : > { %v1970_v14 = vsel %vm1892_vm8, %v1969_v12, %v1948_v3 }
 0x9fd   : > { %v1972_v15 = vmul.f32 %v2561_v11, %v1970_v14 }
 0x9ff   : > { %v1976_v16 = vadd.f32 %v2562_v13, %v1972_v15 }
 0xa01   : > { %v1979_v17 = vsel %vm1895_vm9, %v1976_v16, 0.0 }
 0xa02   : > { %1980 = vadd.xlane.f32.xlu1 %v1979_v17 }
 0xa75   : > { %v1981_v18 = vpop.xlane.xlu1 %1980 }
 0xa76   : > { %v1982_v19 = vmul.f32 %v1981_v18, %v2983_v41 }
 0xa78   : > { %v1983_v20 = vsub.f32 %v1976_v16, %v1982_v19 }
 0xa7a   : > { %v1984_v21 = vmul.f32 %v1983_v20, %v1983_v20  ;;  %v1992_v35 = vmul.f32 %v2563_v32, %v1983_v20 }
 0xa7c   : > { %v1985_v22 = vsel %vm1895_vm9, %v1984_v21, 0.0 }
 0xa7d   : > { %1986 = vadd.xlane.f32.xlu1 %v1985_v22 }
 0xaf0   : > { %v1987_v25 = vpop.xlane.xlu1 %1986 }
 0xaf1   : > { %v1988_v26 = vmul.f32 %v1987_v25, %v2983_v41  ;;  %v2564_v41 = vld [vmem:[%s3350_s19] ss:$0 sm:$0xff] }
 0xaf3   : > { %v1993_v27 = vadd.f32 1e-05, %v1988_v26 }
 0xaf5   : > { %2572 = vrsqrt.f32 %v1993_v27  ;;  %vm2000_vm6 = vweird.f32 %v1993_v27 }
 0xafb   : > { %v2573_v49 = vpop.eup %2572 }
 0xafc   : > { %v1995_v28 = vmul.f32 %v2573_v49, %v1993_v27  ;;  %vm2001_vm5 = vweird.f32 %v2573_v49 }
 0xafd   : > { %vm2002_vm7 = vmor %vm2000_vm6, %vm2001_vm5 }
 0xafe   : > { %v1996_v29 = vmul.f32 %v2573_v49, %v1995_v28 }
 0xb00   : > { %v1997_v30 = vmul.f32 0.5, %v1996_v29 }
 0xb02   : > { %v1998_v60 = vsub.f32 1.5, %v1997_v30 }
 0xb04   : > { %v1999_v34 = vmul.f32 %v2573_v49, %v1998_v60 }
 0xb06   : > { %v2003_v36 = vsel %vm2002_vm7, %v2573_v49, %v1999_v34 }
 0xb07   : > { %v2004_v37 = vmul.f32 %v2003_v36, %v1992_v35 }
 0xb09   : > { %v2008_v38 = vadd.f32 %v2564_v41, %v2004_v37 }
 0xb0b   : > { %v2009_v39 = vpack.c.bf16 %v2008_v38, %v2008_v38 }
 0xb0d   : > { %2381 = vmatmul.msk.bf16.vlgmr.msra.gmra.mxu0 %vm1003_vm4, %v2009_v39 }
 0xb8a   : > { %v2042_v42 = vpop.f32.mrf.mxu0 }
 0xb8b   : > { %v2043_v43 = vadd.f32 %v2565_v40, %v2042_v42 }
 0xb8d   : > { %v2047_v44 = vrot.slane %v2043_v43, 1  ;;  %2049 = vst [vmem:[%s2924_s0] sm:$0x1] %v2043_v43 }
 0xb8f   : > { %2050 = vst [vmem:[%s2924_s0 + $0x1] sm:$0x1] %v2047_v44 }
 0xb92   : > { %v2044_v45 = vpop.f32.mrf.mxu0 }
 0xb93 PF: > { %s3352_s27 = sld [smem:[#allocation18_spill]]  ;;  %s2063_s4 = sshll.u32 %s2924_s0, 4  ;;  %s2064_s4 = int_to_ptr.vmem [resolvable:$true] %s2063_s4 }
 0xb94   : > { %s3353_s26 = sld [smem:[#allocation32_spill]] }
 0xb95   : > { %s3355_s30 = sld [smem:[#allocation8_spill]] }
 0xb9a   : > { %s3354_s20 = smov %s3353_s26  ;;  %s2062_s15 = scalar_lea.hbm %s3353_s26, %s3352_s27 }
 0xb9b   : > { %s2065_s23 = sshll.u32 %s2062_s15, 4  ;;  %s3357_s18 = sand.u32 1, %s3355_s30   ;;  %s2066_s23 = int_to_ptr.hbm [resolvable:$true] %s2065_s23 }
 0xb9c   : > { %s2052_s16 = scalar_lea.sflag [#allocation5], %s3357_s18  ;;  %s2588_s2 = sshra.s32 %s2066_s23, 4  ;;  %s2589_s2 = int_to_ptr.hbm [resolvable:$true] %s2588_s2 }
 0xb9d   : > { %s2590_s1 = scalar_lea.hbm %s2589_s2, 2  ;;  %s2594_s24 = scalar_lea.hbm %s3354_s20, 4 }
 0xb9e   : > { %p2591_p2 = scmp.ne.s32.totalorder %s2589_s2, %s2590_s1  ;;  %p2595_p6 = scmp.lt.s32.totalorder %s2589_s2, %s3354_s20 }
 0xb9f   : > { %p2596_p7 = scmp.lt.s32.totalorder %s2594_s24, %s2590_s1 }
 0xba0   : > { %p2592_p4 = pnand %p2591_p2, %p2844_p3 }
 0xba1   : > { %p2597_p8 = por %p2596_p7, %p2595_p6 }
 0xba2   : > { %p2593_p5 = pneg %p2592_p4 }
 0xba4   : > { %p2598_p10 = pnand %p2597_p8, %p2593_p5 }
 0xba6   : > { %2601 = shalt.err (!%p2598_p10)
}
 0xba7   : > { %s2686_s0 = smov 1  }
 0xba8   : > { %2416 = dma.vmem_to_hbm [thread:$0]  (%p2844_p3), %s2064_s4, 32, %s2066_s23, %s2052_s16, %s2684_s3, %s2684_s3, %s2686_s0  }
 0xba9 PF: > { %s3358_s27 = sld [smem:[#allocation12_spill]] }
 0xbaa   : > { %s3359_s22 = sld [smem:[#allocation7_spill]] }
 0xbaf   : > { %p2422_p11 = scmp.ge.s32.totalorder %s3358_s27, 2 }
 0xbb0   : > { %s2080_s30 = sand.u32 1, %s3359_s22  }
 0xbb1   : > { %p2419_p12 = pnand %p2422_p11, %p2854_p9  ;;  %s2081_s15 = scalar_lea.sflag [#allocation5], %s2080_s30 }
 0xbb3   : > { %p2420_p13 = pneg %p2419_p12 }
 0xbb5   : > { %2635 = dma.done.wait (%p2420_p13), %s2081_s15, 32  }
 0xbb6   : > { %2637 = vsyncadd (%p2420_p13), %s2081_s15, 4294967264  ;;  %s34_s0 = sadd.s32 1, %s3358_s27   ;;  %s3361_s2 = sld [smem:[#allocation8_spill]] }
 0xbb7   : > { %p31_p0 = scmp.ge.s32.totalorder %s34_s0, 6   ;;  %s3362_s25 = sld [smem:[#allocation9_spill]] }
 0xbb8   : > { %s3363_s26 = sld [smem:[#allocation17_spill]] }
 0xbb9   : > { %s3364_s27 = sld [smem:[#allocation10_spill]]  ;;  %33 = sbr.rel (!%p31_p0) target bundleno = 20 (0x14), region = 178 }
 0xbba   : > { %s3365_s3 = sld [smem:[#allocation11_spill]] }
 0xbbb   : > { %s3366_s28 = sld [smem:[#allocation13_spill]] }
 0xbbc   : > { %s3367_s29 = sld [smem:[#allocation15_spill]] }
 0xbbe   :  { %2087 = vsyncpa [#allocation5], 1 }
 0xbbf   :  { %2089 = vsyncpa [#allocation5 + $0x1], 1 }

</bundles_post_ra>
